<compile_context>
chip_gen: v5e
topology: v5e:2x2
jax: 0.10.0
libtpu: 0.0.40
codegen_flags: <defaults>
</compile_context>

<pallas_src>
import jax
import jax.numpy as jnp
from jax.experimental import pallas as pl
from jax.experimental.pallas import tpu as pltpu

# ---- model hyper-parameters (small, consistent with the module) -------------
B = 2             # batch
S = 8             # sequence length
E = 32            # embed_size
H = 32            # num_hiddens
NUM_LAYERS = 2    # wavefront kernel below is specialized to 2 layers
VOCAB = 128       # vocab_size (multiple of 128 -> lane-dense logits stores)
H4 = 4 * H

# TODO(synk): the wavefront + block-diagonal recurrent slab is hard-coded for
# num_layers == 2; a general L needs a banded (L*H, L*4H) slab and an
# (S + L - 1)-step wavefront.
assert NUM_LAYERS == 2


# ---- Pallas kernel: full decoder forward in ONE invocation -------------------
def seq2seq_decoder_kernel(tok_ref, h0_ref, c0_ref, emb_ref, w_in_ref,
                           w_rec_ref, bias_ref, w_out_ref,
                           out_ref, hn_ref, cn_ref,
                           x_scr, h_scr):
    # tok_ref:   (B, S) int32, SMEM              token ids
    # h0_ref/c0: (L, B, H)                       initial LSTM state
    # emb_ref:   (VOCAB, E)                      embedding table
    # w_in_ref:  (E, 4H)                         W_ih_l0^T
    # w_rec_ref: (2H, 8H)                        [[W_hh_l0^T, W_ih_l1^T], [0, W_hh_l1^T]]
    # bias_ref:  (2, 4H)                         row l = b_ih_l + b_hh_l
    # w_out_ref: (H+1, VOCAB)                    rows 0:H = W_dense^T, last row = bias
    # out_ref:   (B, S, VOCAB)                   logits (batch-major)
    # hn_ref/cn: (L, B, H)                       final LSTM state
    # x_scr:     (S*B, E) scratch                gathered embeddings, time-major (row = s*B + b)
    # h_scr:     (B*S, H) scratch                top-layer hiddens, batch-major (row = b*S + s)

    # 1) Fused embedding lookup + time-major transpose: data-dependent row
    #    gather from the VMEM table driven by SMEM token scalars (off the
    #    recurrent critical path).
    for s in range(S):
        for b in range(B):
            r = s * B + b
            x_scr[r:r + 1, :] = emb_ref[pl.ds(tok_ref[b, s], 1), :]

    b_l0 = bias_ref[0:1, :]                                        # (1, 4H)
    b_l1 = bias_ref[1:2, :]                                        # (1, 4H)

    # 2) Layer-0 input projection for ALL timesteps in one MXU matmul.
    xp = jnp.dot(x_scr[...], w_in_ref[...],
                 preferred_element_type=jnp.float32) + b_l0        # (S*B, 4H) time-major

    w_rec = w_rec_ref[...]                                         # (2H, 8H), hoisted

    def lstm_cell(g, c):
        # one sigmoid over the full lane-dense (B, 4H=128) vreg -> i/f/o in a
        # single EUP push; tanh only for the cell candidate and tanh(c).
        sig = jax.nn.sigmoid(g)
        i_g = sig[:, 0:H]
        f_g = sig[:, H:2 * H]
        o_g = sig[:, 3 * H:4 * H]
        g_g = jnp.tanh(g[:, 2 * H:3 * H])
        c_new = f_g * c + i_g * g_g
        h_new = o_g * jnp.tanh(c_new)
        return h_new, c_new

    h_l0, c_l0 = h0_ref[0], c0_ref[0]                              # (B, H)
    h_l1, c_l1 = h0_ref[1], c0_ref[1]                              # (B, H)

    # 3) Wavefront over time: iteration t advances layer 0 to step t and layer 1
    #    to step t-1.  Both layers share ONE (B, 2H) @ (2H, 8H) block matmul:
    #      cols 0:4H  = h_l0_{t-1} @ W_hh_l0
    #      cols 4H:8H = h_l0_{t-1} @ W_ih_l1 + h_l1_{t-2} @ W_hh_l1
    # TODO(synk): for much larger S, switch this unrolled Python loop to
    # lax.fori_loop(unroll=True) with pl.ds indexing to bound trace time.
    for t in range(S + 1):
        lhs = jnp.concatenate([h_l0, h_l1], axis=-1)               # (B, 2H)
        gg = jnp.dot(lhs, w_rec, preferred_element_type=jnp.float32)   # (B, 8H)
        if t < S:                    # layer 0, step t
            g0 = xp[t * B:(t + 1) * B, :] + gg[:, 0:H4]
            h_l0, c_l0 = lstm_cell(g0, c_l0)
        if t >= 1:                   # layer 1, step t-1 (input = previous h_l0)
            g1 = gg[:, H4:2 * H4] + b_l1
            h_l1, c_l1 = lstm_cell(g1, c_l1)
            s_out = t - 1
            for b in range(B):       # per-step stores into batch-major scratch
                h_scr[b * S + s_out:b * S + s_out + 1, :] = h_l1[b:b + 1, :]

    hn_ref[0] = h_l0
    hn_ref[1] = h_l1
    cn_ref[0] = c_l0
    cn_ref[1] = c_l1

    # 4) Dense head: one (B*S, H) @ (H, VOCAB) matmul; VOCAB=128 keeps the
    #    logits store lane-dense (unmasked vst), no transpose/relayout needed.
    logits = jnp.dot(h_scr[...], w_out_ref[0:H, :],
                     preferred_element_type=jnp.float32) + w_out_ref[H:H + 1, :]
    out_ref[...] = logits.reshape(B, S, VOCAB)


def _vmem():
    return pl.BlockSpec(memory_space=pltpu.MemorySpace.VMEM)


def _smem():
    return pl.BlockSpec(memory_space=pltpu.MemorySpace.SMEM)


@jax.jit
def seq2seq_decoder_forward(tokens, h0, c0, emb, w_in, w_rec, biases, w_out):
    """tokens: (B, S) int32; h0/c0: (L, B, H); returns (out, (h_n, c_n))."""
    out, hn, cn = pl.pallas_call(
        seq2seq_decoder_kernel,
        in_specs=[
            _smem(),   # tokens (scalar reads drive the embedding row gather)
            _vmem(),   # h0
            _vmem(),   # c0
            _vmem(),   # embedding table
            _vmem(),   # w_in
            _vmem(),   # w_rec
            _vmem(),   # biases
            _vmem(),   # w_out
        ],
        out_specs=(_vmem(), _vmem(), _vmem()),
        out_shape=(
            jax.ShapeDtypeStruct((B, S, VOCAB), jnp.float32),
            jax.ShapeDtypeStruct((NUM_LAYERS, B, H), jnp.float32),
            jax.ShapeDtypeStruct((NUM_LAYERS, B, H), jnp.float32),
        ),
        scratch_shapes=[
            pltpu.VMEM((S * B, E), jnp.float32),   # gathered embeddings (time-major)
            pltpu.VMEM((B * S, H), jnp.float32),   # top-layer hiddens (batch-major)
        ],
        cost_estimate=pl.CostEstimate(
            flops=900_000, transcendentals=12_288, bytes_accessed=131_072),
    )(tokens, h0, c0, emb, w_in, w_rec, biases, w_out)
    return out, (hn, cn)


# ---- weight packing from natural (PyTorch-layout) parameters -----------------
def pack_params(p):
    w_in = p["weight_ih_l0"].T                                     # (E, 4H)
    b0 = (p["bias_ih_l0"] + p["bias_hh_l0"]).reshape(1, H4)
    b1 = (p["bias_ih_l1"] + p["bias_hh_l1"]).reshape(1, H4)
    biases = jnp.concatenate([b0, b1], axis=0)                     # (2, 4H)
    w_rec = jnp.zeros((2 * H, 2 * H4), jnp.float32)
    w_rec = w_rec.at[0:H, 0:H4].set(p["weight_hh_l0"].T)           # layer-0 recurrent
    w_rec = w_rec.at[0:H, H4:].set(p["weight_ih_l1"].T)            # layer-1 input (from h_l0)
    w_rec = w_rec.at[H:2 * H, H4:].set(p["weight_hh_l1"].T)        # layer-1 recurrent
    w_out = jnp.concatenate(
        [p["dense_w"].T, p["dense_b"].reshape(1, VOCAB)], axis=0)  # (H+1, V)
    return p["embedding"], w_in, w_rec, biases, w_out


# ---- pure-JAX reference (PyTorch semantics) for a correctness check ----------
def reference_forward(tokens, h0, c0, p):
    layer_in = jnp.transpose(p["embedding"][tokens], (1, 0, 2))    # (S, B, E)
    hns, cns = [], []
    for l in range(NUM_LAYERS):
        w_ih = p[f"weight_ih_l{l}"]
        w_hh = p[f"weight_hh_l{l}"]
        bias = p[f"bias_ih_l{l}"] + p[f"bias_hh_l{l}"]
        h, c = h0[l], c0[l]
        outs = []
        for t in range(S):
            g = layer_in[t] @ w_ih.T + h @ w_hh.T + bias
            i_g = jax.nn.sigmoid(g[:, 0:H])
            f_g = jax.nn.sigmoid(g[:, H:2 * H])
            g_g = jnp.tanh(g[:, 2 * H:3 * H])
            o_g = jax.nn.sigmoid(g[:, 3 * H:4 * H])
            c = f_g * c + i_g * g_g
            h = o_g * jnp.tanh(c)
            outs.append(h)
        layer_in = jnp.stack(outs, axis=0)
        hns.append(h)
        cns.append(c)
    out = layer_in @ p["dense_w"].T + p["dense_b"]                 # (S, B, V)
    return jnp.transpose(out, (1, 0, 2)), jnp.stack(hns, 0), jnp.stack(cns, 0)


if __name__ == "__main__":
    key = jax.random.PRNGKey(0)
    ks = jax.random.split(key, 14)
    init = lambda k, shape: jax.random.normal(k, shape, jnp.float32) * 0.1

    tokens = jax.random.randint(ks[0], (B, S), 0, VOCAB, dtype=jnp.int32)
    params = {
        "embedding":    init(ks[1], (VOCAB, E)),
        "weight_ih_l0": init(ks[2], (H4, E)),
        "weight_hh_l0": init(ks[3], (H4, H)),
        "bias_ih_l0":   init(ks[4], (H4,)),
        "bias_hh_l0":   init(ks[5], (H4,)),
        "weight_ih_l1": init(ks[6], (H4, H)),
        "weight_hh_l1": init(ks[7], (H4, H)),
        "bias_ih_l1":   init(ks[8], (H4,)),
        "bias_hh_l1":   init(ks[9], (H4,)),
        "dense_w":      init(ks[10], (VOCAB, H)),
        "dense_b":      init(ks[11], (VOCAB,)),
    }
    h0 = init(ks[12], (NUM_LAYERS, B, H))
    c0 = init(ks[13], (NUM_LAYERS, B, H))

    emb, w_in, w_rec, biases, w_out = pack_params(params)

    out, (hn, cn) = seq2seq_decoder_forward(tokens, h0, c0, emb, w_in, w_rec,
                                            biases, w_out)
    out, hn, cn = jax.block_until_ready((out, hn, cn))

    assert out.shape == (B, S, VOCAB) and out.dtype == jnp.float32
    assert hn.shape == (NUM_LAYERS, B, H) and cn.shape == (NUM_LAYERS, B, H)

    ref_out, ref_hn, ref_cn = reference_forward(tokens, h0, c0, params)
    assert jnp.allclose(out, ref_out, atol=2e-3, rtol=2e-3)
    assert jnp.allclose(hn, ref_hn, atol=2e-3, rtol=2e-3)
    assert jnp.allclose(cn, ref_cn, atol=2e-3, rtol=2e-3)

    print("KERNEL_OK")
</pallas_src>

<mosaic_0001>
module attributes {stable_mosaic.version = 11 : i64} {
  func.func @seq2seq_decoder_kernel(%arg0: memref<2x8xi32, #tpu.memory_space<smem>>, %arg1: memref<2x2x32xf32, #tpu.memory_space<vmem>>, %arg2: memref<2x2x32xf32, #tpu.memory_space<vmem>>, %arg3: memref<128x32xf32, #tpu.memory_space<vmem>>, %arg4: memref<32x128xf32, #tpu.memory_space<vmem>>, %arg5: memref<64x256xf32, #tpu.memory_space<vmem>>, %arg6: memref<2x128xf32, #tpu.memory_space<vmem>>, %arg7: memref<33x128xf32, #tpu.memory_space<vmem>>, %arg8: memref<2x8x128xf32, #tpu.memory_space<vmem>>, %arg9: memref<2x2x32xf32, #tpu.memory_space<vmem>>, %arg10: memref<2x2x32xf32, #tpu.memory_space<vmem>>, %arg11: memref<16x32xf32, #tpu.memory_space<vmem>>, %arg12: memref<16x32xf32, #tpu.memory_space<vmem>>) attributes {dimension_semantics = [], scalar_prefetch = 0 : i64, scratch_operands = 2 : i64, tpu.core_type = #tpu.core_type<tc>} {
    %c0 = arith.constant 0 : index
    %c0_0 = arith.constant 0 : index
    %0 = memref.load %arg0[%c0, %c0_0] : memref<2x8xi32, #tpu.memory_space<smem>>
    %1 = arith.index_cast %0 : i32 to index
    %c0_1 = arith.constant 0 : index
    %2 = vector.load %arg3[%1, %c0_1] : memref<128x32xf32, #tpu.memory_space<vmem>>, vector<1x32xf32>
    %c0_2 = arith.constant 0 : index
    %c0_3 = arith.constant 0 : index
    %3 = vector.load %arg11[%c0_2, %c0_3] : memref<16x32xf32, #tpu.memory_space<vmem>>, vector<1x32xf32>
    tpu.vector_store %arg11[%c0_2, %c0_3], %2 {strides = array<i32>} : memref<16x32xf32, #tpu.memory_space<vmem>>, vector<1x32xf32>,
    %c1 = arith.constant 1 : index
    %c0_4 = arith.constant 0 : index
    %4 = memref.load %arg0[%c1, %c0_4] : memref<2x8xi32, #tpu.memory_space<smem>>
    %5 = arith.index_cast %4 : i32 to index
    %c0_5 = arith.constant 0 : index
    %6 = vector.load %arg3[%5, %c0_5] : memref<128x32xf32, #tpu.memory_space<vmem>>, vector<1x32xf32>
    %c1_6 = arith.constant 1 : index
    %c0_7 = arith.constant 0 : index
    %7 = vector.load %arg11[%c1_6, %c0_7] : memref<16x32xf32, #tpu.memory_space<vmem>>, vector<1x32xf32>
    tpu.vector_store %arg11[%c1_6, %c0_7], %6 {strides = array<i32>} : memref<16x32xf32, #tpu.memory_space<vmem>>, vector<1x32xf32>,
    %c0_8 = arith.constant 0 : index
    %c1_9 = arith.constant 1 : index
    %8 = memref.load %arg0[%c0_8, %c1_9] : memref<2x8xi32, #tpu.memory_space<smem>>
    %9 = arith.index_cast %8 : i32 to index
    %c0_10 = arith.constant 0 : index
    %10 = vector.load %arg3[%9, %c0_10] : memref<128x32xf32, #tpu.memory_space<vmem>>, vector<1x32xf32>
    %c2 = arith.constant 2 : index
    %c0_11 = arith.constant 0 : index
    %11 = vector.load %arg11[%c2, %c0_11] : memref<16x32xf32, #tpu.memory_space<vmem>>, vector<1x32xf32>
    tpu.vector_store %arg11[%c2, %c0_11], %10 {strides = array<i32>} : memref<16x32xf32, #tpu.memory_space<vmem>>, vector<1x32xf32>,
    %c1_12 = arith.constant 1 : index
    %c1_13 = arith.constant 1 : index
    %12 = memref.load %arg0[%c1_12, %c1_13] : memref<2x8xi32, #tpu.memory_space<smem>>
    %13 = arith.index_cast %12 : i32 to index
    %c0_14 = arith.constant 0 : index
    %14 = vector.load %arg3[%13, %c0_14] : memref<128x32xf32, #tpu.memory_space<vmem>>, vector<1x32xf32>
    %c3 = arith.constant 3 : index
    %c0_15 = arith.constant 0 : index
    %15 = vector.load %arg11[%c3, %c0_15] : memref<16x32xf32, #tpu.memory_space<vmem>>, vector<1x32xf32>
    tpu.vector_store %arg11[%c3, %c0_15], %14 {strides = array<i32>} : memref<16x32xf32, #tpu.memory_space<vmem>>, vector<1x32xf32>,
    %c0_16 = arith.constant 0 : index
    %c2_17 = arith.constant 2 : index
    %16 = memref.load %arg0[%c0_16, %c2_17] : memref<2x8xi32, #tpu.memory_space<smem>>
    %17 = arith.index_cast %16 : i32 to index
    %c0_18 = arith.constant 0 : index
    %18 = vector.load %arg3[%17, %c0_18] : memref<128x32xf32, #tpu.memory_space<vmem>>, vector<1x32xf32>
    %c4 = arith.constant 4 : index
    %c0_19 = arith.constant 0 : index
    %19 = vector.load %arg11[%c4, %c0_19] : memref<16x32xf32, #tpu.memory_space<vmem>>, vector<1x32xf32>
    tpu.vector_store %arg11[%c4, %c0_19], %18 {strides = array<i32>} : memref<16x32xf32, #tpu.memory_space<vmem>>, vector<1x32xf32>,
    %c1_20 = arith.constant 1 : index
    %c2_21 = arith.constant 2 : index
    %20 = memref.load %arg0[%c1_20, %c2_21] : memref<2x8xi32, #tpu.memory_space<smem>>
    %21 = arith.index_cast %20 : i32 to index
    %c0_22 = arith.constant 0 : index
    %22 = vector.load %arg3[%21, %c0_22] : memref<128x32xf32, #tpu.memory_space<vmem>>, vector<1x32xf32>
    %c5 = arith.constant 5 : index
    %c0_23 = arith.constant 0 : index
    %23 = vector.load %arg11[%c5, %c0_23] : memref<16x32xf32, #tpu.memory_space<vmem>>, vector<1x32xf32>
    tpu.vector_store %arg11[%c5, %c0_23], %22 {strides = array<i32>} : memref<16x32xf32, #tpu.memory_space<vmem>>, vector<1x32xf32>,
    %c0_24 = arith.constant 0 : index
    %c3_25 = arith.constant 3 : index
    %24 = memref.load %arg0[%c0_24, %c3_25] : memref<2x8xi32, #tpu.memory_space<smem>>
    %25 = arith.index_cast %24 : i32 to index
    %c0_26 = arith.constant 0 : index
    %26 = vector.load %arg3[%25, %c0_26] : memref<128x32xf32, #tpu.memory_space<vmem>>, vector<1x32xf32>
    %c6 = arith.constant 6 : index
    %c0_27 = arith.constant 0 : index
    %27 = vector.load %arg11[%c6, %c0_27] : memref<16x32xf32, #tpu.memory_space<vmem>>, vector<1x32xf32>
    tpu.vector_store %arg11[%c6, %c0_27], %26 {strides = array<i32>} : memref<16x32xf32, #tpu.memory_space<vmem>>, vector<1x32xf32>,
    %c1_28 = arith.constant 1 : index
    %c3_29 = arith.constant 3 : index
    %28 = memref.load %arg0[%c1_28, %c3_29] : memref<2x8xi32, #tpu.memory_space<smem>>
    %29 = arith.index_cast %28 : i32 to index
    %c0_30 = arith.constant 0 : index
    %30 = vector.load %arg3[%29, %c0_30] : memref<128x32xf32, #tpu.memory_space<vmem>>, vector<1x32xf32>
    %c7 = arith.constant 7 : index
    %c0_31 = arith.constant 0 : index
    %31 = vector.load %arg11[%c7, %c0_31] : memref<16x32xf32, #tpu.memory_space<vmem>>, vector<1x32xf32>
    tpu.vector_store %arg11[%c7, %c0_31], %30 {strides = array<i32>} : memref<16x32xf32, #tpu.memory_space<vmem>>, vector<1x32xf32>,
    %c0_32 = arith.constant 0 : index
    %c4_33 = arith.constant 4 : index
    %32 = memref.load %arg0[%c0_32, %c4_33] : memref<2x8xi32, #tpu.memory_space<smem>>
    %33 = arith.index_cast %32 : i32 to index
    %c0_34 = arith.constant 0 : index
    %34 = vector.load %arg3[%33, %c0_34] : memref<128x32xf32, #tpu.memory_space<vmem>>, vector<1x32xf32>
    %c8 = arith.constant 8 : index
    %c0_35 = arith.constant 0 : index
    %35 = vector.load %arg11[%c8, %c0_35] : memref<16x32xf32, #tpu.memory_space<vmem>>, vector<1x32xf32>
    tpu.vector_store %arg11[%c8, %c0_35], %34 {strides = array<i32>} : memref<16x32xf32, #tpu.memory_space<vmem>>, vector<1x32xf32>,
    %c1_36 = arith.constant 1 : index
    %c4_37 = arith.constant 4 : index
    %36 = memref.load %arg0[%c1_36, %c4_37] : memref<2x8xi32, #tpu.memory_space<smem>>
    %37 = arith.index_cast %36 : i32 to index
    %c0_38 = arith.constant 0 : index
    %38 = vector.load %arg3[%37, %c0_38] : memref<128x32xf32, #tpu.memory_space<vmem>>, vector<1x32xf32>
    %c9 = arith.constant 9 : index
    %c0_39 = arith.constant 0 : index
    %39 = vector.load %arg11[%c9, %c0_39] : memref<16x32xf32, #tpu.memory_space<vmem>>, vector<1x32xf32>
    tpu.vector_store %arg11[%c9, %c0_39], %38 {strides = array<i32>} : memref<16x32xf32, #tpu.memory_space<vmem>>, vector<1x32xf32>,
    %c0_40 = arith.constant 0 : index
    %c5_41 = arith.constant 5 : index
    %40 = memref.load %arg0[%c0_40, %c5_41] : memref<2x8xi32, #tpu.memory_space<smem>>
    %41 = arith.index_cast %40 : i32 to index
    %c0_42 = arith.constant 0 : index
    %42 = vector.load %arg3[%41, %c0_42] : memref<128x32xf32, #tpu.memory_space<vmem>>, vector<1x32xf32>
    %c10 = arith.constant 10 : index
    %c0_43 = arith.constant 0 : index
    %43 = vector.load %arg11[%c10, %c0_43] : memref<16x32xf32, #tpu.memory_space<vmem>>, vector<1x32xf32>
    tpu.vector_store %arg11[%c10, %c0_43], %42 {strides = array<i32>} : memref<16x32xf32, #tpu.memory_space<vmem>>, vector<1x32xf32>,
    %c1_44 = arith.constant 1 : index
    %c5_45 = arith.constant 5 : index
    %44 = memref.load %arg0[%c1_44, %c5_45] : memref<2x8xi32, #tpu.memory_space<smem>>
    %45 = arith.index_cast %44 : i32 to index
    %c0_46 = arith.constant 0 : index
    %46 = vector.load %arg3[%45, %c0_46] : memref<128x32xf32, #tpu.memory_space<vmem>>, vector<1x32xf32>
    %c11 = arith.constant 11 : index
    %c0_47 = arith.constant 0 : index
    %47 = vector.load %arg11[%c11, %c0_47] : memref<16x32xf32, #tpu.memory_space<vmem>>, vector<1x32xf32>
    tpu.vector_store %arg11[%c11, %c0_47], %46 {strides = array<i32>} : memref<16x32xf32, #tpu.memory_space<vmem>>, vector<1x32xf32>,
    %c0_48 = arith.constant 0 : index
    %c6_49 = arith.constant 6 : index
    %48 = memref.load %arg0[%c0_48, %c6_49] : memref<2x8xi32, #tpu.memory_space<smem>>
    %49 = arith.index_cast %48 : i32 to index
    %c0_50 = arith.constant 0 : index
    %50 = vector.load %arg3[%49, %c0_50] : memref<128x32xf32, #tpu.memory_space<vmem>>, vector<1x32xf32>
    %c12 = arith.constant 12 : index
    %c0_51 = arith.constant 0 : index
    %51 = vector.load %arg11[%c12, %c0_51] : memref<16x32xf32, #tpu.memory_space<vmem>>, vector<1x32xf32>
    tpu.vector_store %arg11[%c12, %c0_51], %50 {strides = array<i32>} : memref<16x32xf32, #tpu.memory_space<vmem>>, vector<1x32xf32>,
    %c1_52 = arith.constant 1 : index
    %c6_53 = arith.constant 6 : index
    %52 = memref.load %arg0[%c1_52, %c6_53] : memref<2x8xi32, #tpu.memory_space<smem>>
    %53 = arith.index_cast %52 : i32 to index
    %c0_54 = arith.constant 0 : index
    %54 = vector.load %arg3[%53, %c0_54] : memref<128x32xf32, #tpu.memory_space<vmem>>, vector<1x32xf32>
    %c13 = arith.constant 13 : index
    %c0_55 = arith.constant 0 : index
    %55 = vector.load %arg11[%c13, %c0_55] : memref<16x32xf32, #tpu.memory_space<vmem>>, vector<1x32xf32>
    tpu.vector_store %arg11[%c13, %c0_55], %54 {strides = array<i32>} : memref<16x32xf32, #tpu.memory_space<vmem>>, vector<1x32xf32>,
    %c0_56 = arith.constant 0 : index
    %c7_57 = arith.constant 7 : index
    %56 = memref.load %arg0[%c0_56, %c7_57] : memref<2x8xi32, #tpu.memory_space<smem>>
    %57 = arith.index_cast %56 : i32 to index
    %c0_58 = arith.constant 0 : index
    %58 = vector.load %arg3[%57, %c0_58] : memref<128x32xf32, #tpu.memory_space<vmem>>, vector<1x32xf32>
    %c14 = arith.constant 14 : index
    %c0_59 = arith.constant 0 : index
    %59 = vector.load %arg11[%c14, %c0_59] : memref<16x32xf32, #tpu.memory_space<vmem>>, vector<1x32xf32>
    tpu.vector_store %arg11[%c14, %c0_59], %58 {strides = array<i32>} : memref<16x32xf32, #tpu.memory_space<vmem>>, vector<1x32xf32>,
    %c1_60 = arith.constant 1 : index
    %c7_61 = arith.constant 7 : index
    %60 = memref.load %arg0[%c1_60, %c7_61] : memref<2x8xi32, #tpu.memory_space<smem>>
    %61 = arith.index_cast %60 : i32 to index
    %c0_62 = arith.constant 0 : index
    %62 = vector.load %arg3[%61, %c0_62] : memref<128x32xf32, #tpu.memory_space<vmem>>, vector<1x32xf32>
    %c15 = arith.constant 15 : index
    %c0_63 = arith.constant 0 : index
    %63 = vector.load %arg11[%c15, %c0_63] : memref<16x32xf32, #tpu.memory_space<vmem>>, vector<1x32xf32>
    tpu.vector_store %arg11[%c15, %c0_63], %62 {strides = array<i32>} : memref<16x32xf32, #tpu.memory_space<vmem>>, vector<1x32xf32>,
    %c0_64 = arith.constant 0 : index
    %c0_65 = arith.constant 0 : index
    %64 = vector.load %arg6[%c0_64, %c0_65] : memref<2x128xf32, #tpu.memory_space<vmem>>, vector<1x128xf32>
    %c1_66 = arith.constant 1 : index
    %c0_67 = arith.constant 0 : index
    %65 = vector.load %arg6[%c1_66, %c0_67] : memref<2x128xf32, #tpu.memory_space<vmem>>, vector<1x128xf32>
    %c0_68 = arith.constant 0 : index
    %c0_69 = arith.constant 0 : index
    %66 = vector.load %arg11[%c0_68, %c0_69] : memref<16x32xf32, #tpu.memory_space<vmem>>, vector<16x32xf32>
    %c0_70 = arith.constant 0 : index
    %c0_71 = arith.constant 0 : index
    %67 = vector.load %arg4[%c0_70, %c0_71] : memref<32x128xf32, #tpu.memory_space<vmem>>, vector<32x128xf32>
    %cst = arith.constant dense<0.000000e+00> : vector<16x128xf32>
    %68 = tpu.matmul %66, %67, %cst {dimension_numbers = #tpu.dot_dimension_numbers<[1], [0], [0], [1], [0, 0, 1, 1], [], []>} : vector<16x32xf32>, vector<32x128xf32>, vector<16x128xf32> -> vector<16x128xf32>
    %69 = vector.broadcast %64 : vector<1x128xf32> to vector<16x128xf32>
    %70 = arith.addf %68, %69 : vector<16x128xf32>
    %c0_72 = arith.constant 0 : index
    %c0_73 = arith.constant 0 : index
    %71 = vector.load %arg5[%c0_72, %c0_73] : memref<64x256xf32, #tpu.memory_space<vmem>>, vector<64x256xf32>
    %c0_74 = arith.constant 0 : index
    %c0_75 = arith.constant 0 : index
    %c0_76 = arith.constant 0 : index
    %72 = vector.load %arg1[%c0_74, %c0_75, %c0_76] : memref<2x2x32xf32, #tpu.memory_space<vmem>>, vector<1x2x32xf32>
    %73 = vector.shape_cast %72 : vector<1x2x32xf32> to vector<2x32xf32>
    %c0_77 = arith.constant 0 : index
    %c0_78 = arith.constant 0 : index
    %c0_79 = arith.constant 0 : index
    %74 = vector.load %arg2[%c0_77, %c0_78, %c0_79] : memref<2x2x32xf32, #tpu.memory_space<vmem>>, vector<1x2x32xf32>
    %75 = vector.shape_cast %74 : vector<1x2x32xf32> to vector<2x32xf32>
    %c1_80 = arith.constant 1 : index
    %c0_81 = arith.constant 0 : index
    %c0_82 = arith.constant 0 : index
    %76 = vector.load %arg1[%c1_80, %c0_81, %c0_82] : memref<2x2x32xf32, #tpu.memory_space<vmem>>, vector<1x2x32xf32>
    %77 = vector.shape_cast %76 : vector<1x2x32xf32> to vector<2x32xf32>
    %c1_83 = arith.constant 1 : index
    %c0_84 = arith.constant 0 : index
    %c0_85 = arith.constant 0 : index
    %78 = vector.load %arg2[%c1_83, %c0_84, %c0_85] : memref<2x2x32xf32, #tpu.memory_space<vmem>>, vector<1x2x32xf32>
    %79 = vector.shape_cast %78 : vector<1x2x32xf32> to vector<2x32xf32>
    %80 = tpu.concatenate %73, %77 in 1 : vector<2x32xf32>, vector<2x32xf32> -> vector<2x64xf32>
    %cst_86 = arith.constant dense<0.000000e+00> : vector<2x256xf32>
    %81 = tpu.matmul %80, %71, %cst_86 {dimension_numbers = #tpu.dot_dimension_numbers<[1], [0], [0], [1], [0, 0, 1, 1], [], []>} : vector<2x64xf32>, vector<64x256xf32>, vector<2x256xf32> -> vector<2x256xf32>
    %82 = vector.extract_strided_slice %70 {offsets = [0, 0], sizes = [2, 128], strides = [1, 1]} : vector<16x128xf32> to vector<2x128xf32>
    %83 = vector.extract_strided_slice %81 {offsets = [0, 0], sizes = [2, 128], strides = [1, 1]} : vector<2x256xf32> to vector<2x128xf32>
    %84 = arith.addf %82, %83 : vector<2x128xf32>
    %85 = arith.negf %84 : vector<2x128xf32>
    %86 = math.exp %85 : vector<2x128xf32>
    %cst_87 = arith.constant 1.000000e+00 : f32
    %87 = vector.broadcast %cst_87 : f32 to vector<2x128xf32>
    %88 = arith.addf %87, %86 : vector<2x128xf32>
    %89 = arith.divf %87, %88 : vector<2x128xf32>
    %90 = vector.extract_strided_slice %89 {offsets = [0, 0], sizes = [2, 32], strides = [1, 1]} : vector<2x128xf32> to vector<2x32xf32>
    %91 = vector.extract_strided_slice %89 {offsets = [0, 32], sizes = [2, 32], strides = [1, 1]} : vector<2x128xf32> to vector<2x32xf32>
    %92 = vector.extract_strided_slice %89 {offsets = [0, 96], sizes = [2, 32], strides = [1, 1]} : vector<2x128xf32> to vector<2x32xf32>
    %93 = vector.extract_strided_slice %84 {offsets = [0, 64], sizes = [2, 32], strides = [1, 1]} : vector<2x128xf32> to vector<2x32xf32>
    %94 = math.tanh %93 : vector<2x32xf32>
    %95 = arith.mulf %91, %75 : vector<2x32xf32>
    %96 = arith.mulf %90, %94 : vector<2x32xf32>
    %97 = arith.addf %95, %96 : vector<2x32xf32>
    %98 = math.tanh %97 : vector<2x32xf32>
    %99 = arith.mulf %92, %98 : vector<2x32xf32>
    %100 = tpu.concatenate %99, %77 in 1 : vector<2x32xf32>, vector<2x32xf32> -> vector<2x64xf32>
    %cst_88 = arith.constant dense<0.000000e+00> : vector<2x256xf32>
    %101 = tpu.matmul %100, %71, %cst_88 {dimension_numbers = #tpu.dot_dimension_numbers<[1], [0], [0], [1], [0, 0, 1, 1], [], []>} : vector<2x64xf32>, vector<64x256xf32>, vector<2x256xf32> -> vector<2x256xf32>
    %102 = vector.extract_strided_slice %70 {offsets = [2, 0], sizes = [2, 128], strides = [1, 1]} : vector<16x128xf32> to vector<2x128xf32>
    %103 = vector.extract_strided_slice %101 {offsets = [0, 0], sizes = [2, 128], strides = [1, 1]} : vector<2x256xf32> to vector<2x128xf32>
    %104 = arith.addf %102, %103 : vector<2x128xf32>
    %105 = arith.negf %104 : vector<2x128xf32>
    %106 = math.exp %105 : vector<2x128xf32>
    %cst_89 = arith.constant 1.000000e+00 : f32
    %107 = vector.broadcast %cst_89 : f32 to vector<2x128xf32>
    %108 = arith.addf %107, %106 : vector<2x128xf32>
    %109 = arith.divf %107, %108 : vector<2x128xf32>
    %110 = vector.extract_strided_slice %109 {offsets = [0, 0], sizes = [2, 32], strides = [1, 1]} : vector<2x128xf32> to vector<2x32xf32>
    %111 = vector.extract_strided_slice %109 {offsets = [0, 32], sizes = [2, 32], strides = [1, 1]} : vector<2x128xf32> to vector<2x32xf32>
    %112 = vector.extract_strided_slice %109 {offsets = [0, 96], sizes = [2, 32], strides = [1, 1]} : vector<2x128xf32> to vector<2x32xf32>
    %113 = vector.extract_strided_slice %104 {offsets = [0, 64], sizes = [2, 32], strides = [1, 1]} : vector<2x128xf32> to vector<2x32xf32>
    %114 = math.tanh %113 : vector<2x32xf32>
    %115 = arith.mulf %111, %97 : vector<2x32xf32>
    %116 = arith.mulf %110, %114 : vector<2x32xf32>
    %117 = arith.addf %115, %116 : vector<2x32xf32>
    %118 = math.tanh %117 : vector<2x32xf32>
    %119 = arith.mulf %112, %118 : vector<2x32xf32>
    %120 = vector.extract_strided_slice %101 {offsets = [0, 128], sizes = [2, 128], strides = [1, 1]} : vector<2x256xf32> to vector<2x128xf32>
    %121 = vector.broadcast %65 : vector<1x128xf32> to vector<2x128xf32>
    %122 = arith.addf %120, %121 : vector<2x128xf32>
    %123 = arith.negf %122 : vector<2x128xf32>
    %124 = math.exp %123 : vector<2x128xf32>
    %cst_90 = arith.constant 1.000000e+00 : f32
    %125 = vector.broadcast %cst_90 : f32 to vector<2x128xf32>
    %126 = arith.addf %125, %124 : vector<2x128xf32>
    %127 = arith.divf %125, %126 : vector<2x128xf32>
    %128 = vector.extract_strided_slice %127 {offsets = [0, 0], sizes = [2, 32], strides = [1, 1]} : vector<2x128xf32> to vector<2x32xf32>
    %129 = vector.extract_strided_slice %127 {offsets = [0, 32], sizes = [2, 32], strides = [1, 1]} : vector<2x128xf32> to vector<2x32xf32>
    %130 = vector.extract_strided_slice %127 {offsets = [0, 96], sizes = [2, 32], strides = [1, 1]} : vector<2x128xf32> to vector<2x32xf32>
    %131 = vector.extract_strided_slice %122 {offsets = [0, 64], sizes = [2, 32], strides = [1, 1]} : vector<2x128xf32> to vector<2x32xf32>
    %132 = math.tanh %131 : vector<2x32xf32>
    %133 = arith.mulf %129, %79 : vector<2x32xf32>
    %134 = arith.mulf %128, %132 : vector<2x32xf32>
    %135 = arith.addf %133, %134 : vector<2x32xf32>
    %136 = math.tanh %135 : vector<2x32xf32>
    %137 = arith.mulf %130, %136 : vector<2x32xf32>
    %138 = vector.extract_strided_slice %137 {offsets = [0, 0], sizes = [1, 32], strides = [1, 1]} : vector<2x32xf32> to vector<1x32xf32>
    %c0_91 = arith.constant 0 : index
    %c0_92 = arith.constant 0 : index
    %139 = vector.load %arg12[%c0_91, %c0_92] : memref<16x32xf32, #tpu.memory_space<vmem>>, vector<1x32xf32>
    tpu.vector_store %arg12[%c0_91, %c0_92], %138 {strides = array<i32>} : memref<16x32xf32, #tpu.memory_space<vmem>>, vector<1x32xf32>,
    %140 = vector.extract_strided_slice %137 {offsets = [1, 0], sizes = [1, 32], strides = [1, 1]} : vector<2x32xf32> to vector<1x32xf32>
    %c8_93 = arith.constant 8 : index
    %c0_94 = arith.constant 0 : index
    %141 = vector.load %arg12[%c8_93, %c0_94] : memref<16x32xf32, #tpu.memory_space<vmem>>, vector<1x32xf32>
    tpu.vector_store %arg12[%c8_93, %c0_94], %140 {strides = array<i32>} : memref<16x32xf32, #tpu.memory_space<vmem>>, vector<1x32xf32>,
    %142 = tpu.concatenate %119, %137 in 1 : vector<2x32xf32>, vector<2x32xf32> -> vector<2x64xf32>
    %cst_95 = arith.constant dense<0.000000e+00> : vector<2x256xf32>
    %143 = tpu.matmul %142, %71, %cst_95 {dimension_numbers = #tpu.dot_dimension_numbers<[1], [0], [0], [1], [0, 0, 1, 1], [], []>} : vector<2x64xf32>, vector<64x256xf32>, vector<2x256xf32> -> vector<2x256xf32>
    %144 = vector.extract_strided_slice %70 {offsets = [4, 0], sizes = [2, 128], strides = [1, 1]} : vector<16x128xf32> to vector<2x128xf32>
    %145 = vector.extract_strided_slice %143 {offsets = [0, 0], sizes = [2, 128], strides = [1, 1]} : vector<2x256xf32> to vector<2x128xf32>
    %146 = arith.addf %144, %145 : vector<2x128xf32>
    %147 = arith.negf %146 : vector<2x128xf32>
    %148 = math.exp %147 : vector<2x128xf32>
    %cst_96 = arith.constant 1.000000e+00 : f32
    %149 = vector.broadcast %cst_96 : f32 to vector<2x128xf32>
    %150 = arith.addf %149, %148 : vector<2x128xf32>
    %151 = arith.divf %149, %150 : vector<2x128xf32>
    %152 = vector.extract_strided_slice %151 {offsets = [0, 0], sizes = [2, 32], strides = [1, 1]} : vector<2x128xf32> to vector<2x32xf32>
    %153 = vector.extract_strided_slice %151 {offsets = [0, 32], sizes = [2, 32], strides = [1, 1]} : vector<2x128xf32> to vector<2x32xf32>
    %154 = vector.extract_strided_slice %151 {offsets = [0, 96], sizes = [2, 32], strides = [1, 1]} : vector<2x128xf32> to vector<2x32xf32>
    %155 = vector.extract_strided_slice %146 {offsets = [0, 64], sizes = [2, 32], strides = [1, 1]} : vector<2x128xf32> to vector<2x32xf32>
    %156 = math.tanh %155 : vector<2x32xf32>
    %157 = arith.mulf %153, %117 : vector<2x32xf32>
    %158 = arith.mulf %152, %156 : vector<2x32xf32>
    %159 = arith.addf %157, %158 : vector<2x32xf32>
    %160 = math.tanh %159 : vector<2x32xf32>
    %161 = arith.mulf %154, %160 : vector<2x32xf32>
    %162 = vector.extract_strided_slice %143 {offsets = [0, 128], sizes = [2, 128], strides = [1, 1]} : vector<2x256xf32> to vector<2x128xf32>
    %163 = vector.broadcast %65 : vector<1x128xf32> to vector<2x128xf32>
    %164 = arith.addf %162, %163 : vector<2x128xf32>
    %165 = arith.negf %164 : vector<2x128xf32>
    %166 = math.exp %165 : vector<2x128xf32>
    %cst_97 = arith.constant 1.000000e+00 : f32
    %167 = vector.broadcast %cst_97 : f32 to vector<2x128xf32>
    %168 = arith.addf %167, %166 : vector<2x128xf32>
    %169 = arith.divf %167, %168 : vector<2x128xf32>
    %170 = vector.extract_strided_slice %169 {offsets = [0, 0], sizes = [2, 32], strides = [1, 1]} : vector<2x128xf32> to vector<2x32xf32>
    %171 = vector.extract_strided_slice %169 {offsets = [0, 32], sizes = [2, 32], strides = [1, 1]} : vector<2x128xf32> to vector<2x32xf32>
    %172 = vector.extract_strided_slice %169 {offsets = [0, 96], sizes = [2, 32], strides = [1, 1]} : vector<2x128xf32> to vector<2x32xf32>
    %173 = vector.extract_strided_slice %164 {offsets = [0, 64], sizes = [2, 32], strides = [1, 1]} : vector<2x128xf32> to vector<2x32xf32>
    %174 = math.tanh %173 : vector<2x32xf32>
    %175 = arith.mulf %171, %135 : vector<2x32xf32>
    %176 = arith.mulf %170, %174 : vector<2x32xf32>
    %177 = arith.addf %175, %176 : vector<2x32xf32>
    %178 = math.tanh %177 : vector<2x32xf32>
    %179 = arith.mulf %172, %178 : vector<2x32xf32>
    %180 = vector.extract_strided_slice %179 {offsets = [0, 0], sizes = [1, 32], strides = [1, 1]} : vector<2x32xf32> to vector<1x32xf32>
    %c1_98 = arith.constant 1 : index
    %c0_99 = arith.constant 0 : index
    %181 = vector.load %arg12[%c1_98, %c0_99] : memref<16x32xf32, #tpu.memory_space<vmem>>, vector<1x32xf32>
    tpu.vector_store %arg12[%c1_98, %c0_99], %180 {strides = array<i32>} : memref<16x32xf32, #tpu.memory_space<vmem>>, vector<1x32xf32>,
    %182 = vector.extract_strided_slice %179 {offsets = [1, 0], sizes = [1, 32], strides = [1, 1]} : vector<2x32xf32> to vector<1x32xf32>
    %c9_100 = arith.constant 9 : index
    %c0_101 = arith.constant 0 : index
    %183 = vector.load %arg12[%c9_100, %c0_101] : memref<16x32xf32, #tpu.memory_space<vmem>>, vector<1x32xf32>
    tpu.vector_store %arg12[%c9_100, %c0_101], %182 {strides = array<i32>} : memref<16x32xf32, #tpu.memory_space<vmem>>, vector<1x32xf32>,
    %184 = tpu.concatenate %161, %179 in 1 : vector<2x32xf32>, vector<2x32xf32> -> vector<2x64xf32>
    %cst_102 = arith.constant dense<0.000000e+00> : vector<2x256xf32>
    %185 = tpu.matmul %184, %71, %cst_102 {dimension_numbers = #tpu.dot_dimension_numbers<[1], [0], [0], [1], [0, 0, 1, 1], [], []>} : vector<2x64xf32>, vector<64x256xf32>, vector<2x256xf32> -> vector<2x256xf32>
    %186 = vector.extract_strided_slice %70 {offsets = [6, 0], sizes = [2, 128], strides = [1, 1]} : vector<16x128xf32> to vector<2x128xf32>
    %187 = vector.extract_strided_slice %185 {offsets = [0, 0], sizes = [2, 128], strides = [1, 1]} : vector<2x256xf32> to vector<2x128xf32>
    %188 = arith.addf %186, %187 : vector<2x128xf32>
    %189 = arith.negf %188 : vector<2x128xf32>
    %190 = math.exp %189 : vector<2x128xf32>
    %cst_103 = arith.constant 1.000000e+00 : f32
    %191 = vector.broadcast %cst_103 : f32 to vector<2x128xf32>
    %192 = arith.addf %191, %190 : vector<2x128xf32>
    %193 = arith.divf %191, %192 : vector<2x128xf32>
    %194 = vector.extract_strided_slice %193 {offsets = [0, 0], sizes = [2, 32], strides = [1, 1]} : vector<2x128xf32> to vector<2x32xf32>
    %195 = vector.extract_strided_slice %193 {offsets = [0, 32], sizes = [2, 32], strides = [1, 1]} : vector<2x128xf32> to vector<2x32xf32>
    %196 = vector.extract_strided_slice %193 {offsets = [0, 96], sizes = [2, 32], strides = [1, 1]} : vector<2x128xf32> to vector<2x32xf32>
    %197 = vector.extract_strided_slice %188 {offsets = [0, 64], sizes = [2, 32], strides = [1, 1]} : vector<2x128xf32> to vector<2x32xf32>
    %198 = math.tanh %197 : vector<2x32xf32>
    %199 = arith.mulf %195, %159 : vector<2x32xf32>
    %200 = arith.mulf %194, %198 : vector<2x32xf32>
    %201 = arith.addf %199, %200 : vector<2x32xf32>
    %202 = math.tanh %201 : vector<2x32xf32>
    %203 = arith.mulf %196, %202 : vector<2x32xf32>
    %204 = vector.extract_strided_slice %185 {offsets = [0, 128], sizes = [2, 128], strides = [1, 1]} : vector<2x256xf32> to vector<2x128xf32>
    %205 = vector.broadcast %65 : vector<1x128xf32> to vector<2x128xf32>
    %206 = arith.addf %204, %205 : vector<2x128xf32>
    %207 = arith.negf %206 : vector<2x128xf32>
    %208 = math.exp %207 : vector<2x128xf32>
    %cst_104 = arith.constant 1.000000e+00 : f32
    %209 = vector.broadcast %cst_104 : f32 to vector<2x128xf32>
    %210 = arith.addf %209, %208 : vector<2x128xf32>
    %211 = arith.divf %209, %210 : vector<2x128xf32>
    %212 = vector.extract_strided_slice %211 {offsets = [0, 0], sizes = [2, 32], strides = [1, 1]} : vector<2x128xf32> to vector<2x32xf32>
    %213 = vector.extract_strided_slice %211 {offsets = [0, 32], sizes = [2, 32], strides = [1, 1]} : vector<2x128xf32> to vector<2x32xf32>
    %214 = vector.extract_strided_slice %211 {offsets = [0, 96], sizes = [2, 32], strides = [1, 1]} : vector<2x128xf32> to vector<2x32xf32>
    %215 = vector.extract_strided_slice %206 {offsets = [0, 64], sizes = [2, 32], strides = [1, 1]} : vector<2x128xf32> to vector<2x32xf32>
    %216 = math.tanh %215 : vector<2x32xf32>
    %217 = arith.mulf %213, %177 : vector<2x32xf32>
    %218 = arith.mulf %212, %216 : vector<2x32xf32>
    %219 = arith.addf %217, %218 : vector<2x32xf32>
    %220 = math.tanh %219 : vector<2x32xf32>
    %221 = arith.mulf %214, %220 : vector<2x32xf32>
    %222 = vector.extract_strided_slice %221 {offsets = [0, 0], sizes = [1, 32], strides = [1, 1]} : vector<2x32xf32> to vector<1x32xf32>
    %c2_105 = arith.constant 2 : index
    %c0_106 = arith.constant 0 : index
    %223 = vector.load %arg12[%c2_105, %c0_106] : memref<16x32xf32, #tpu.memory_space<vmem>>, vector<1x32xf32>
    tpu.vector_store %arg12[%c2_105, %c0_106], %222 {strides = array<i32>} : memref<16x32xf32, #tpu.memory_space<vmem>>, vector<1x32xf32>,
    %224 = vector.extract_strided_slice %221 {offsets = [1, 0], sizes = [1, 32], strides = [1, 1]} : vector<2x32xf32> to vector<1x32xf32>
    %c10_107 = arith.constant 10 : index
    %c0_108 = arith.constant 0 : index
    %225 = vector.load %arg12[%c10_107, %c0_108] : memref<16x32xf32, #tpu.memory_space<vmem>>, vector<1x32xf32>
    tpu.vector_store %arg12[%c10_107, %c0_108], %224 {strides = array<i32>} : memref<16x32xf32, #tpu.memory_space<vmem>>, vector<1x32xf32>,
    %226 = tpu.concatenate %203, %221 in 1 : vector<2x32xf32>, vector<2x32xf32> -> vector<2x64xf32>
    %cst_109 = arith.constant dense<0.000000e+00> : vector<2x256xf32>
    %227 = tpu.matmul %226, %71, %cst_109 {dimension_numbers = #tpu.dot_dimension_numbers<[1], [0], [0], [1], [0, 0, 1, 1], [], []>} : vector<2x64xf32>, vector<64x256xf32>, vector<2x256xf32> -> vector<2x256xf32>
    %228 = vector.extract_strided_slice %70 {offsets = [8, 0], sizes = [2, 128], strides = [1, 1]} : vector<16x128xf32> to vector<2x128xf32>
    %229 = vector.extract_strided_slice %227 {offsets = [0, 0], sizes = [2, 128], strides = [1, 1]} : vector<2x256xf32> to vector<2x128xf32>
    %230 = arith.addf %228, %229 : vector<2x128xf32>
    %231 = arith.negf %230 : vector<2x128xf32>
    %232 = math.exp %231 : vector<2x128xf32>
    %cst_110 = arith.constant 1.000000e+00 : f32
    %233 = vector.broadcast %cst_110 : f32 to vector<2x128xf32>
    %234 = arith.addf %233, %232 : vector<2x128xf32>
    %235 = arith.divf %233, %234 : vector<2x128xf32>
    %236 = vector.extract_strided_slice %235 {offsets = [0, 0], sizes = [2, 32], strides = [1, 1]} : vector<2x128xf32> to vector<2x32xf32>
    %237 = vector.extract_strided_slice %235 {offsets = [0, 32], sizes = [2, 32], strides = [1, 1]} : vector<2x128xf32> to vector<2x32xf32>
    %238 = vector.extract_strided_slice %235 {offsets = [0, 96], sizes = [2, 32], strides = [1, 1]} : vector<2x128xf32> to vector<2x32xf32>
    %239 = vector.extract_strided_slice %230 {offsets = [0, 64], sizes = [2, 32], strides = [1, 1]} : vector<2x128xf32> to vector<2x32xf32>
    %240 = math.tanh %239 : vector<2x32xf32>
    %241 = arith.mulf %237, %201 : vector<2x32xf32>
    %242 = arith.mulf %236, %240 : vector<2x32xf32>
    %243 = arith.addf %241, %242 : vector<2x32xf32>
    %244 = math.tanh %243 : vector<2x32xf32>
    %245 = arith.mulf %238, %244 : vector<2x32xf32>
    %246 = vector.extract_strided_slice %227 {offsets = [0, 128], sizes = [2, 128], strides = [1, 1]} : vector<2x256xf32> to vector<2x128xf32>
    %247 = vector.broadcast %65 : vector<1x128xf32> to vector<2x128xf32>
    %248 = arith.addf %246, %247 : vector<2x128xf32>
    %249 = arith.negf %248 : vector<2x128xf32>
    %250 = math.exp %249 : vector<2x128xf32>
    %cst_111 = arith.constant 1.000000e+00 : f32
    %251 = vector.broadcast %cst_111 : f32 to vector<2x128xf32>
    %252 = arith.addf %251, %250 : vector<2x128xf32>
    %253 = arith.divf %251, %252 : vector<2x128xf32>
    %254 = vector.extract_strided_slice %253 {offsets = [0, 0], sizes = [2, 32], strides = [1, 1]} : vector<2x128xf32> to vector<2x32xf32>
    %255 = vector.extract_strided_slice %253 {offsets = [0, 32], sizes = [2, 32], strides = [1, 1]} : vector<2x128xf32> to vector<2x32xf32>
    %256 = vector.extract_strided_slice %253 {offsets = [0, 96], sizes = [2, 32], strides = [1, 1]} : vector<2x128xf32> to vector<2x32xf32>
    %257 = vector.extract_strided_slice %248 {offsets = [0, 64], sizes = [2, 32], strides = [1, 1]} : vector<2x128xf32> to vector<2x32xf32>
    %258 = math.tanh %257 : vector<2x32xf32>
    %259 = arith.mulf %255, %219 : vector<2x32xf32>
    %260 = arith.mulf %254, %258 : vector<2x32xf32>
    %261 = arith.addf %259, %260 : vector<2x32xf32>
    %262 = math.tanh %261 : vector<2x32xf32>
    %263 = arith.mulf %256, %262 : vector<2x32xf32>
    %264 = vector.extract_strided_slice %263 {offsets = [0, 0], sizes = [1, 32], strides = [1, 1]} : vector<2x32xf32> to vector<1x32xf32>
    %c3_112 = arith.constant 3 : index
    %c0_113 = arith.constant 0 : index
    %265 = vector.load %arg12[%c3_112, %c0_113] : memref<16x32xf32, #tpu.memory_space<vmem>>, vector<1x32xf32>
    tpu.vector_store %arg12[%c3_112, %c0_113], %264 {strides = array<i32>} : memref<16x32xf32, #tpu.memory_space<vmem>>, vector<1x32xf32>,
    %266 = vector.extract_strided_slice %263 {offsets = [1, 0], sizes = [1, 32], strides = [1, 1]} : vector<2x32xf32> to vector<1x32xf32>
    %c11_114 = arith.constant 11 : index
    %c0_115 = arith.constant 0 : index
    %267 = vector.load %arg12[%c11_114, %c0_115] : memref<16x32xf32, #tpu.memory_space<vmem>>, vector<1x32xf32>
    tpu.vector_store %arg12[%c11_114, %c0_115], %266 {strides = array<i32>} : memref<16x32xf32, #tpu.memory_space<vmem>>, vector<1x32xf32>,
    %268 = tpu.concatenate %245, %263 in 1 : vector<2x32xf32>, vector<2x32xf32> -> vector<2x64xf32>
    %cst_116 = arith.constant dense<0.000000e+00> : vector<2x256xf32>
    %269 = tpu.matmul %268, %71, %cst_116 {dimension_numbers = #tpu.dot_dimension_numbers<[1], [0], [0], [1], [0, 0, 1, 1], [], []>} : vector<2x64xf32>, vector<64x256xf32>, vector<2x256xf32> -> vector<2x256xf32>
    %270 = vector.extract_strided_slice %70 {offsets = [10, 0], sizes = [2, 128], strides = [1, 1]} : vector<16x128xf32> to vector<2x128xf32>
    %271 = vector.extract_strided_slice %269 {offsets = [0, 0], sizes = [2, 128], strides = [1, 1]} : vector<2x256xf32> to vector<2x128xf32>
    %272 = arith.addf %270, %271 : vector<2x128xf32>
    %273 = arith.negf %272 : vector<2x128xf32>
    %274 = math.exp %273 : vector<2x128xf32>
    %cst_117 = arith.constant 1.000000e+00 : f32
    %275 = vector.broadcast %cst_117 : f32 to vector<2x128xf32>
    %276 = arith.addf %275, %274 : vector<2x128xf32>
    %277 = arith.divf %275, %276 : vector<2x128xf32>
    %278 = vector.extract_strided_slice %277 {offsets = [0, 0], sizes = [2, 32], strides = [1, 1]} : vector<2x128xf32> to vector<2x32xf32>
    %279 = vector.extract_strided_slice %277 {offsets = [0, 32], sizes = [2, 32], strides = [1, 1]} : vector<2x128xf32> to vector<2x32xf32>
    %280 = vector.extract_strided_slice %277 {offsets = [0, 96], sizes = [2, 32], strides = [1, 1]} : vector<2x128xf32> to vector<2x32xf32>
    %281 = vector.extract_strided_slice %272 {offsets = [0, 64], sizes = [2, 32], strides = [1, 1]} : vector<2x128xf32> to vector<2x32xf32>
    %282 = math.tanh %281 : vector<2x32xf32>
    %283 = arith.mulf %279, %243 : vector<2x32xf32>
    %284 = arith.mulf %278, %282 : vector<2x32xf32>
    %285 = arith.addf %283, %284 : vector<2x32xf32>
    %286 = math.tanh %285 : vector<2x32xf32>
    %287 = arith.mulf %280, %286 : vector<2x32xf32>
    %288 = vector.extract_strided_slice %269 {offsets = [0, 128], sizes = [2, 128], strides = [1, 1]} : vector<2x256xf32> to vector<2x128xf32>
    %289 = vector.broadcast %65 : vector<1x128xf32> to vector<2x128xf32>
    %290 = arith.addf %288, %289 : vector<2x128xf32>
    %291 = arith.negf %290 : vector<2x128xf32>
    %292 = math.exp %291 : vector<2x128xf32>
    %cst_118 = arith.constant 1.000000e+00 : f32
    %293 = vector.broadcast %cst_118 : f32 to vector<2x128xf32>
    %294 = arith.addf %293, %292 : vector<2x128xf32>
    %295 = arith.divf %293, %294 : vector<2x128xf32>
    %296 = vector.extract_strided_slice %295 {offsets = [0, 0], sizes = [2, 32], strides = [1, 1]} : vector<2x128xf32> to vector<2x32xf32>
    %297 = vector.extract_strided_slice %295 {offsets = [0, 32], sizes = [2, 32], strides = [1, 1]} : vector<2x128xf32> to vector<2x32xf32>
    %298 = vector.extract_strided_slice %295 {offsets = [0, 96], sizes = [2, 32], strides = [1, 1]} : vector<2x128xf32> to vector<2x32xf32>
    %299 = vector.extract_strided_slice %290 {offsets = [0, 64], sizes = [2, 32], strides = [1, 1]} : vector<2x128xf32> to vector<2x32xf32>
    %300 = math.tanh %299 : vector<2x32xf32>
    %301 = arith.mulf %297, %261 : vector<2x32xf32>
    %302 = arith.mulf %296, %300 : vector<2x32xf32>
    %303 = arith.addf %301, %302 : vector<2x32xf32>
    %304 = math.tanh %303 : vector<2x32xf32>
    %305 = arith.mulf %298, %304 : vector<2x32xf32>
    %306 = vector.extract_strided_slice %305 {offsets = [0, 0], sizes = [1, 32], strides = [1, 1]} : vector<2x32xf32> to vector<1x32xf32>
    %c4_119 = arith.constant 4 : index
    %c0_120 = arith.constant 0 : index
    %307 = vector.load %arg12[%c4_119, %c0_120] : memref<16x32xf32, #tpu.memory_space<vmem>>, vector<1x32xf32>
    tpu.vector_store %arg12[%c4_119, %c0_120], %306 {strides = array<i32>} : memref<16x32xf32, #tpu.memory_space<vmem>>, vector<1x32xf32>,
    %308 = vector.extract_strided_slice %305 {offsets = [1, 0], sizes = [1, 32], strides = [1, 1]} : vector<2x32xf32> to vector<1x32xf32>
    %c12_121 = arith.constant 12 : index
    %c0_122 = arith.constant 0 : index
    %309 = vector.load %arg12[%c12_121, %c0_122] : memref<16x32xf32, #tpu.memory_space<vmem>>, vector<1x32xf32>
    tpu.vector_store %arg12[%c12_121, %c0_122], %308 {strides = array<i32>} : memref<16x32xf32, #tpu.memory_space<vmem>>, vector<1x32xf32>,
    %310 = tpu.concatenate %287, %305 in 1 : vector<2x32xf32>, vector<2x32xf32> -> vector<2x64xf32>
    %cst_123 = arith.constant dense<0.000000e+00> : vector<2x256xf32>
    %311 = tpu.matmul %310, %71, %cst_123 {dimension_numbers = #tpu.dot_dimension_numbers<[1], [0], [0], [1], [0, 0, 1, 1], [], []>} : vector<2x64xf32>, vector<64x256xf32>, vector<2x256xf32> -> vector<2x256xf32>
    %312 = vector.extract_strided_slice %70 {offsets = [12, 0], sizes = [2, 128], strides = [1, 1]} : vector<16x128xf32> to vector<2x128xf32>
    %313 = vector.extract_strided_slice %311 {offsets = [0, 0], sizes = [2, 128], strides = [1, 1]} : vector<2x256xf32> to vector<2x128xf32>
    %314 = arith.addf %312, %313 : vector<2x128xf32>
    %315 = arith.negf %314 : vector<2x128xf32>
    %316 = math.exp %315 : vector<2x128xf32>
    %cst_124 = arith.constant 1.000000e+00 : f32
    %317 = vector.broadcast %cst_124 : f32 to vector<2x128xf32>
    %318 = arith.addf %317, %316 : vector<2x128xf32>
    %319 = arith.divf %317, %318 : vector<2x128xf32>
    %320 = vector.extract_strided_slice %319 {offsets = [0, 0], sizes = [2, 32], strides = [1, 1]} : vector<2x128xf32> to vector<2x32xf32>
    %321 = vector.extract_strided_slice %319 {offsets = [0, 32], sizes = [2, 32], strides = [1, 1]} : vector<2x128xf32> to vector<2x32xf32>
    %322 = vector.extract_strided_slice %319 {offsets = [0, 96], sizes = [2, 32], strides = [1, 1]} : vector<2x128xf32> to vector<2x32xf32>
    %323 = vector.extract_strided_slice %314 {offsets = [0, 64], sizes = [2, 32], strides = [1, 1]} : vector<2x128xf32> to vector<2x32xf32>
    %324 = math.tanh %323 : vector<2x32xf32>
    %325 = arith.mulf %321, %285 : vector<2x32xf32>
    %326 = arith.mulf %320, %324 : vector<2x32xf32>
    %327 = arith.addf %325, %326 : vector<2x32xf32>
    %328 = math.tanh %327 : vector<2x32xf32>
    %329 = arith.mulf %322, %328 : vector<2x32xf32>
    %330 = vector.extract_strided_slice %311 {offsets = [0, 128], sizes = [2, 128], strides = [1, 1]} : vector<2x256xf32> to vector<2x128xf32>
    %331 = vector.broadcast %65 : vector<1x128xf32> to vector<2x128xf32>
    %332 = arith.addf %330, %331 : vector<2x128xf32>
    %333 = arith.negf %332 : vector<2x128xf32>
    %334 = math.exp %333 : vector<2x128xf32>
    %cst_125 = arith.constant 1.000000e+00 : f32
    %335 = vector.broadcast %cst_125 : f32 to vector<2x128xf32>
    %336 = arith.addf %335, %334 : vector<2x128xf32>
    %337 = arith.divf %335, %336 : vector<2x128xf32>
    %338 = vector.extract_strided_slice %337 {offsets = [0, 0], sizes = [2, 32], strides = [1, 1]} : vector<2x128xf32> to vector<2x32xf32>
    %339 = vector.extract_strided_slice %337 {offsets = [0, 32], sizes = [2, 32], strides = [1, 1]} : vector<2x128xf32> to vector<2x32xf32>
    %340 = vector.extract_strided_slice %337 {offsets = [0, 96], sizes = [2, 32], strides = [1, 1]} : vector<2x128xf32> to vector<2x32xf32>
    %341 = vector.extract_strided_slice %332 {offsets = [0, 64], sizes = [2, 32], strides = [1, 1]} : vector<2x128xf32> to vector<2x32xf32>
    %342 = math.tanh %341 : vector<2x32xf32>
    %343 = arith.mulf %339, %303 : vector<2x32xf32>
    %344 = arith.mulf %338, %342 : vector<2x32xf32>
    %345 = arith.addf %343, %344 : vector<2x32xf32>
    %346 = math.tanh %345 : vector<2x32xf32>
    %347 = arith.mulf %340, %346 : vector<2x32xf32>
    %348 = vector.extract_strided_slice %347 {offsets = [0, 0], sizes = [1, 32], strides = [1, 1]} : vector<2x32xf32> to vector<1x32xf32>
    %c5_126 = arith.constant 5 : index
    %c0_127 = arith.constant 0 : index
    %349 = vector.load %arg12[%c5_126, %c0_127] : memref<16x32xf32, #tpu.memory_space<vmem>>, vector<1x32xf32>
    tpu.vector_store %arg12[%c5_126, %c0_127], %348 {strides = array<i32>} : memref<16x32xf32, #tpu.memory_space<vmem>>, vector<1x32xf32>,
    %350 = vector.extract_strided_slice %347 {offsets = [1, 0], sizes = [1, 32], strides = [1, 1]} : vector<2x32xf32> to vector<1x32xf32>
    %c13_128 = arith.constant 13 : index
    %c0_129 = arith.constant 0 : index
    %351 = vector.load %arg12[%c13_128, %c0_129] : memref<16x32xf32, #tpu.memory_space<vmem>>, vector<1x32xf32>
    tpu.vector_store %arg12[%c13_128, %c0_129], %350 {strides = array<i32>} : memref<16x32xf32, #tpu.memory_space<vmem>>, vector<1x32xf32>,
    %352 = tpu.concatenate %329, %347 in 1 : vector<2x32xf32>, vector<2x32xf32> -> vector<2x64xf32>
    %cst_130 = arith.constant dense<0.000000e+00> : vector<2x256xf32>
    %353 = tpu.matmul %352, %71, %cst_130 {dimension_numbers = #tpu.dot_dimension_numbers<[1], [0], [0], [1], [0, 0, 1, 1], [], []>} : vector<2x64xf32>, vector<64x256xf32>, vector<2x256xf32> -> vector<2x256xf32>
    %354 = vector.extract_strided_slice %70 {offsets = [14, 0], sizes = [2, 128], strides = [1, 1]} : vector<16x128xf32> to vector<2x128xf32>
    %355 = vector.extract_strided_slice %353 {offsets = [0, 0], sizes = [2, 128], strides = [1, 1]} : vector<2x256xf32> to vector<2x128xf32>
    %356 = arith.addf %354, %355 : vector<2x128xf32>
    %357 = arith.negf %356 : vector<2x128xf32>
    %358 = math.exp %357 : vector<2x128xf32>
    %cst_131 = arith.constant 1.000000e+00 : f32
    %359 = vector.broadcast %cst_131 : f32 to vector<2x128xf32>
    %360 = arith.addf %359, %358 : vector<2x128xf32>
    %361 = arith.divf %359, %360 : vector<2x128xf32>
    %362 = vector.extract_strided_slice %361 {offsets = [0, 0], sizes = [2, 32], strides = [1, 1]} : vector<2x128xf32> to vector<2x32xf32>
    %363 = vector.extract_strided_slice %361 {offsets = [0, 32], sizes = [2, 32], strides = [1, 1]} : vector<2x128xf32> to vector<2x32xf32>
    %364 = vector.extract_strided_slice %361 {offsets = [0, 96], sizes = [2, 32], strides = [1, 1]} : vector<2x128xf32> to vector<2x32xf32>
    %365 = vector.extract_strided_slice %356 {offsets = [0, 64], sizes = [2, 32], strides = [1, 1]} : vector<2x128xf32> to vector<2x32xf32>
    %366 = math.tanh %365 : vector<2x32xf32>
    %367 = arith.mulf %363, %327 : vector<2x32xf32>
    %368 = arith.mulf %362, %366 : vector<2x32xf32>
    %369 = arith.addf %367, %368 : vector<2x32xf32>
    %370 = math.tanh %369 : vector<2x32xf32>
    %371 = arith.mulf %364, %370 : vector<2x32xf32>
    %372 = vector.extract_strided_slice %353 {offsets = [0, 128], sizes = [2, 128], strides = [1, 1]} : vector<2x256xf32> to vector<2x128xf32>
    %373 = vector.broadcast %65 : vector<1x128xf32> to vector<2x128xf32>
    %374 = arith.addf %372, %373 : vector<2x128xf32>
    %375 = arith.negf %374 : vector<2x128xf32>
    %376 = math.exp %375 : vector<2x128xf32>
    %cst_132 = arith.constant 1.000000e+00 : f32
    %377 = vector.broadcast %cst_132 : f32 to vector<2x128xf32>
    %378 = arith.addf %377, %376 : vector<2x128xf32>
    %379 = arith.divf %377, %378 : vector<2x128xf32>
    %380 = vector.extract_strided_slice %379 {offsets = [0, 0], sizes = [2, 32], strides = [1, 1]} : vector<2x128xf32> to vector<2x32xf32>
    %381 = vector.extract_strided_slice %379 {offsets = [0, 32], sizes = [2, 32], strides = [1, 1]} : vector<2x128xf32> to vector<2x32xf32>
    %382 = vector.extract_strided_slice %379 {offsets = [0, 96], sizes = [2, 32], strides = [1, 1]} : vector<2x128xf32> to vector<2x32xf32>
    %383 = vector.extract_strided_slice %374 {offsets = [0, 64], sizes = [2, 32], strides = [1, 1]} : vector<2x128xf32> to vector<2x32xf32>
    %384 = math.tanh %383 : vector<2x32xf32>
    %385 = arith.mulf %381, %345 : vector<2x32xf32>
    %386 = arith.mulf %380, %384 : vector<2x32xf32>
    %387 = arith.addf %385, %386 : vector<2x32xf32>
    %388 = math.tanh %387 : vector<2x32xf32>
    %389 = arith.mulf %382, %388 : vector<2x32xf32>
    %390 = vector.extract_strided_slice %389 {offsets = [0, 0], sizes = [1, 32], strides = [1, 1]} : vector<2x32xf32> to vector<1x32xf32>
    %c6_133 = arith.constant 6 : index
    %c0_134 = arith.constant 0 : index
    %391 = vector.load %arg12[%c6_133, %c0_134] : memref<16x32xf32, #tpu.memory_space<vmem>>, vector<1x32xf32>
    tpu.vector_store %arg12[%c6_133, %c0_134], %390 {strides = array<i32>} : memref<16x32xf32, #tpu.memory_space<vmem>>, vector<1x32xf32>,
    %392 = vector.extract_strided_slice %389 {offsets = [1, 0], sizes = [1, 32], strides = [1, 1]} : vector<2x32xf32> to vector<1x32xf32>
    %c14_135 = arith.constant 14 : index
    %c0_136 = arith.constant 0 : index
    %393 = vector.load %arg12[%c14_135, %c0_136] : memref<16x32xf32, #tpu.memory_space<vmem>>, vector<1x32xf32>
    tpu.vector_store %arg12[%c14_135, %c0_136], %392 {strides = array<i32>} : memref<16x32xf32, #tpu.memory_space<vmem>>, vector<1x32xf32>,
    %394 = tpu.concatenate %371, %389 in 1 : vector<2x32xf32>, vector<2x32xf32> -> vector<2x64xf32>
    %cst_137 = arith.constant dense<0.000000e+00> : vector<2x256xf32>
    %395 = tpu.matmul %394, %71, %cst_137 {dimension_numbers = #tpu.dot_dimension_numbers<[1], [0], [0], [1], [0, 0, 1, 1], [], []>} : vector<2x64xf32>, vector<64x256xf32>, vector<2x256xf32> -> vector<2x256xf32>
    %396 = vector.extract_strided_slice %395 {offsets = [0, 128], sizes = [2, 128], strides = [1, 1]} : vector<2x256xf32> to vector<2x128xf32>
    %397 = vector.broadcast %65 : vector<1x128xf32> to vector<2x128xf32>
    %398 = arith.addf %396, %397 : vector<2x128xf32>
    %399 = arith.negf %398 : vector<2x128xf32>
    %400 = math.exp %399 : vector<2x128xf32>
    %cst_138 = arith.constant 1.000000e+00 : f32
    %401 = vector.broadcast %cst_138 : f32 to vector<2x128xf32>
    %402 = arith.addf %401, %400 : vector<2x128xf32>
    %403 = arith.divf %401, %402 : vector<2x128xf32>
    %404 = vector.extract_strided_slice %403 {offsets = [0, 0], sizes = [2, 32], strides = [1, 1]} : vector<2x128xf32> to vector<2x32xf32>
    %405 = vector.extract_strided_slice %403 {offsets = [0, 32], sizes = [2, 32], strides = [1, 1]} : vector<2x128xf32> to vector<2x32xf32>
    %406 = vector.extract_strided_slice %403 {offsets = [0, 96], sizes = [2, 32], strides = [1, 1]} : vector<2x128xf32> to vector<2x32xf32>
    %407 = vector.extract_strided_slice %398 {offsets = [0, 64], sizes = [2, 32], strides = [1, 1]} : vector<2x128xf32> to vector<2x32xf32>
    %408 = math.tanh %407 : vector<2x32xf32>
    %409 = arith.mulf %405, %387 : vector<2x32xf32>
    %410 = arith.mulf %404, %408 : vector<2x32xf32>
    %411 = arith.addf %409, %410 : vector<2x32xf32>
    %412 = math.tanh %411 : vector<2x32xf32>
    %413 = arith.mulf %406, %412 : vector<2x32xf32>
    %414 = vector.extract_strided_slice %413 {offsets = [0, 0], sizes = [1, 32], strides = [1, 1]} : vector<2x32xf32> to vector<1x32xf32>
    %c7_139 = arith.constant 7 : index
    %c0_140 = arith.constant 0 : index
    %415 = vector.load %arg12[%c7_139, %c0_140] : memref<16x32xf32, #tpu.memory_space<vmem>>, vector<1x32xf32>
    tpu.vector_store %arg12[%c7_139, %c0_140], %414 {strides = array<i32>} : memref<16x32xf32, #tpu.memory_space<vmem>>, vector<1x32xf32>,
    %416 = vector.extract_strided_slice %413 {offsets = [1, 0], sizes = [1, 32], strides = [1, 1]} : vector<2x32xf32> to vector<1x32xf32>
    %c15_141 = arith.constant 15 : index
    %c0_142 = arith.constant 0 : index
    %417 = vector.load %arg12[%c15_141, %c0_142] : memref<16x32xf32, #tpu.memory_space<vmem>>, vector<1x32xf32>
    tpu.vector_store %arg12[%c15_141, %c0_142], %416 {strides = array<i32>} : memref<16x32xf32, #tpu.memory_space<vmem>>, vector<1x32xf32>,
    %c0_143 = arith.constant 0 : index
    %c0_144 = arith.constant 0 : index
    %c0_145 = arith.constant 0 : index
    %418 = vector.load %arg9[%c0_143, %c0_144, %c0_145] : memref<2x2x32xf32, #tpu.memory_space<vmem>>, vector<1x2x32xf32>
    %419 = vector.shape_cast %418 : vector<1x2x32xf32> to vector<2x32xf32>
    %420 = vector.shape_cast %371 : vector<2x32xf32> to vector<1x2x32xf32>
    tpu.vector_store %arg9[%c0_143, %c0_144, %c0_145], %420 {strides = array<i32>} : memref<2x2x32xf32, #tpu.memory_space<vmem>>, vector<1x2x32xf32>,
    %c1_146 = arith.constant 1 : index
    %c0_147 = arith.constant 0 : index
    %c0_148 = arith.constant 0 : index
    %421 = vector.load %arg9[%c1_146, %c0_147, %c0_148] : memref<2x2x32xf32, #tpu.memory_space<vmem>>, vector<1x2x32xf32>
    %422 = vector.shape_cast %421 : vector<1x2x32xf32> to vector<2x32xf32>
    %423 = vector.shape_cast %413 : vector<2x32xf32> to vector<1x2x32xf32>
    tpu.vector_store %arg9[%c1_146, %c0_147, %c0_148], %423 {strides = array<i32>} : memref<2x2x32xf32, #tpu.memory_space<vmem>>, vector<1x2x32xf32>,
    %c0_149 = arith.constant 0 : index
    %c0_150 = arith.constant 0 : index
    %c0_151 = arith.constant 0 : index
    %424 = vector.load %arg10[%c0_149, %c0_150, %c0_151] : memref<2x2x32xf32, #tpu.memory_space<vmem>>, vector<1x2x32xf32>
    %425 = vector.shape_cast %424 : vector<1x2x32xf32> to vector<2x32xf32>
    %426 = vector.shape_cast %369 : vector<2x32xf32> to vector<1x2x32xf32>
    tpu.vector_store %arg10[%c0_149, %c0_150, %c0_151], %426 {strides = array<i32>} : memref<2x2x32xf32, #tpu.memory_space<vmem>>, vector<1x2x32xf32>,
    %c1_152 = arith.constant 1 : index
    %c0_153 = arith.constant 0 : index
    %c0_154 = arith.constant 0 : index
    %427 = vector.load %arg10[%c1_152, %c0_153, %c0_154] : memref<2x2x32xf32, #tpu.memory_space<vmem>>, vector<1x2x32xf32>
    %428 = vector.shape_cast %427 : vector<1x2x32xf32> to vector<2x32xf32>
    %429 = vector.shape_cast %411 : vector<2x32xf32> to vector<1x2x32xf32>
    tpu.vector_store %arg10[%c1_152, %c0_153, %c0_154], %429 {strides = array<i32>} : memref<2x2x32xf32, #tpu.memory_space<vmem>>, vector<1x2x32xf32>,
    %c0_155 = arith.constant 0 : index
    %c0_156 = arith.constant 0 : index
    %430 = vector.load %arg12[%c0_155, %c0_156] : memref<16x32xf32, #tpu.memory_space<vmem>>, vector<16x32xf32>
    %c0_157 = arith.constant 0 : index
    %c0_158 = arith.constant 0 : index
    %431 = vector.load %arg7[%c0_157, %c0_158] : memref<33x128xf32, #tpu.memory_space<vmem>>, vector<32x128xf32>
    %cst_159 = arith.constant dense<0.000000e+00> : vector<16x128xf32>
    %432 = tpu.matmul %430, %431, %cst_159 {dimension_numbers = #tpu.dot_dimension_numbers<[1], [0], [0], [1], [0, 0, 1, 1], [], []>} : vector<16x32xf32>, vector<32x128xf32>, vector<16x128xf32> -> vector<16x128xf32>
    %c32 = arith.constant 32 : index
    %c0_160 = arith.constant 0 : index
    %433 = vector.load %arg7[%c32, %c0_160] : memref<33x128xf32, #tpu.memory_space<vmem>>, vector<1x128xf32>
    %434 = vector.broadcast %433 : vector<1x128xf32> to vector<16x128xf32>
    %435 = arith.addf %432, %434 : vector<16x128xf32>
    %436 = vector.shape_cast %435 : vector<16x128xf32> to vector<2x8x128xf32>
    %c0_161 = arith.constant 0 : index
    %c0_162 = arith.constant 0 : index
    %c0_163 = arith.constant 0 : index
    %437 = vector.load %arg8[%c0_161, %c0_162, %c0_163] : memref<2x8x128xf32, #tpu.memory_space<vmem>>, vector<2x8x128xf32>
    tpu.vector_store %arg8[%c0_161, %c0_162, %c0_163], %436 {strides = array<i32>} : memref<2x8x128xf32, #tpu.memory_space<vmem>>, vector<2x8x128xf32>,
    return
  }
}

</mosaic_0001>

<bundles_post_ra>
// kernel: seq2seq_decoder_forward.1
= control target key start
LH: loop header
LB: loop body
LE: loop exit
PB: predicated region body
PF: predicated region fallthrough
CT: control target
= control target key end

     0   :  { %16 = vsyncpa [#allocation7], 0  ;;  %s2475_s0 = inlined_call_operand.hbm [shape: s32[2,8], index: 0, kind: input, shape index: {}]   ;;  %s2476_s1 = inlined_call_operand.vmem [shape: f32[2,2,32], index: 1, kind: input, shape index: {}]   ;;  %s2477_s2 = inlined_call_operand.hbm [shape: f32[2,2,32], index: 2, kind: input, shape index: {}]   ;;  %s2478_s3 = inlined_call_operand.vmem [shape: f32[128,32], index: 3, kind: input, shape index: {}]   ;;  %s2479_s4 = inlined_call_operand.vmem [shape: f32[32,128], index: 4, kind: input, shape index: {}]   ;;  %s2480_s5 = inlined_call_operand.vmem [shape: f32[64,256], index: 5, kind: input, shape index: {}]   ;;  %s2481_s6 = inlined_call_operand.hbm [shape: f32[2,128], index: 6, kind: input, shape index: {}]   ;;  %s2482_s7 = inlined_call_operand.hbm [shape: f32[33,128], index: 7, kind: input, shape index: {}]   ;;  %s2483_s8 = inlined_call_operand.hbm [shape: f32[2,8,128], index: 8, kind: output, shape index: {0}]   ;;  %s2484_s9 = inlined_call_operand.hbm [shape: f32[2,2,32], index: 9, kind: output, shape index: {1}]   ;;  %s2485_s10 = inlined_call_operand.hbm [shape: f32[2,2,32], index: 10, kind: output, shape index: {2}]  }
   0x1   :  { %17 = vsyncpa [#allocation5], 0 }
   0x2   :  { %18 = vsyncpa [#allocation10], 0 }
   0x3   :  { %19 = vsyncpa [#allocation6], 0  ;;  %s56_s15 = sshll.u32 %s2481_s6, 4  ;;  %s57_s15 = int_to_ptr.hbm [resolvable:$true] %s56_s15 }
   0x4   :  { %20 = vsyncpa [#allocation14], 0  ;;  %s1843_s16 = smov [#allocation9]   ;;  %s26_s20 = sshll.u32 %s2475_s0, 4  ;;  %s27_s20 = int_to_ptr.hbm [resolvable:$true] %s26_s20 }
   0x5   :  { %s58_s17 = sshll.u32 %s1843_s16, 4  ;;  %s1844_s21 = smov [#allocation4]   ;;  %s59_s17 = int_to_ptr.vmem [resolvable:$true] %s58_s17 }
   0x6   :  { %61 = dma.hbm_to_vmem [thread:$0]  %s57_s15, 32, %s59_s17, [#allocation10]  }
   0x7   :  { %29 = dma.hbm_to_smem %s27_s20, 32, %s1844_s21, [#allocation7]  }
   0x8   :  { %s36_s24 = sshll.u32 %s2477_s2, 4  ;;  %s1845_s25 = smov [#allocation8]   ;;  %s37_s24 = int_to_ptr.hbm [resolvable:$true] %s36_s24 }
   0x9   :  { %s38_s6 = sshll.u32 %s1845_s25, 4  ;;  %s66_s28 = sshll.u32 %s2482_s7, 4  ;;  %s39_s6 = int_to_ptr.vmem [resolvable:$true] %s38_s6  ;;  %s67_s28 = int_to_ptr.hbm [resolvable:$true] %s66_s28 }
   0xa   :  { %s1846_s29 = smov 32   ;;  %s1847_s30 = smov 2  }
   0xb   :  { %44 = dma.hbm_to_vmem [thread:$0]  %s37_s24, 64, %s39_s6, [#allocation5], %s1846_s29, %s1846_s29, %s1847_s30  }
   0xc   :  { %s1848_s0 = smov [#allocation11]   ;;  %s2486_s12 = smov 128  }
   0xd   :  { %s68_s11 = sshll.u32 %s1848_s0, 4  ;;  %s2487_s2 = smov 8   ;;  %s69_s11 = int_to_ptr.vmem [resolvable:$true] %s68_s11 }
   0xe   :  { %74 = dma.hbm_to_vmem [thread:$0]  %s67_s28, 640, %s69_s11, [#allocation10], %s2486_s12, %s2486_s12, %s2487_s2  }
   0xf   :  { %1833 = dma.done.wait [#allocation7], 32  }
  0x10   :  { %1834 = vsyncadd [#allocation7], 4294967264 }
  0x11   :  { %1835 = dma.done.wait [#allocation5], 64  }
  0x12   :  { %1836 = vsyncadd [#allocation5], 4294967232 }
  0x13   :  { %1837 = dma.done.wait [#allocation10], 672  }
  0x14   :  { %1838 = vsyncadd [#allocation10], 4294966624 }
  0x15   :  { %91 = sfence }
  0x16   :  { %v1493_v0 = vld [vmem:[%s2476_s1 + $0x2] sm:$0x3]  ;;  %v1935_v1 = vld [vmem:[%s2480_s5 + $0x70] sm:$0xff]  ;;  %v164_v3 = vld [vmem:[%s2479_s4 + $0x18] sm:$0xff]  ;;  %s92_s15 = sld [smem:[#allocation4]]  ;;  %vm95_vm0 = vcmask 253952  }
  0x17   :  { %v1940_v2 = vld [vmem:[%s2480_s5 + $0x60] sm:$0xff]  ;;  %219 = vrot.lane.b32.xlu0 %v1493_v0, %s1846_s29  ;;  %235 = vmatpush.msra.mxu1 %v1935_v1  ;;  %v1950_v4 = vld [vmem:[%s2480_s5 + $0x50] sm:$0xff]  ;;  %v162_v6 = vld [vmem:[%s2479_s4 + $0x8] sm:$0xff]  ;;  %s1476_s16 = sld [smem:[#allocation4 + $0x80]]  ;;  %vm166_vm1 = vcmask 261120   ;;  %vm223_vm2 = vcmask 523264  }
  0x18   :  { %185 = vmatpush.msra.mxu0 %v164_v3  ;;  %v163_v5 = vld [vmem:[%s2479_s4 + $0x10] sm:$0xff]  ;;  %305 = vmatpush.msra.mxu2 %v1935_v1  ;;  %v1963_v7 = vld [vmem:[%s2480_s5 + $0x40] sm:$0xff]  ;;  %s1477_s17 = sld [smem:[#allocation4 + $0x1]]  ;;  %v2082_v52 = vld [vmem:[%s2480_s5 + $0x78] sm:$0xff]  ;;  %s1854_s0 = smov [#allocation15]  }
  0x19   :  { %236 = vmatpush.msra.mxu1 %v1940_v2  ;;  %v161_v8 = vld [vmem:[%s2479_s4] sm:$0xff]  ;;  %v1973_v9 = vld [vmem:[%s2480_s5 + $0x30] sm:$0xff]  ;;  %s1478_s18 = sld [smem:[#allocation4 + $0x81]]  ;;  %v2087_v53 = vld [vmem:[%s2480_s5 + $0x68] sm:$0xff]  ;;  %325 = vmatpush.msra.mxu3 %v2082_v52 }
  0x1a   :  { %186 = vmatpush.msra.mxu0 %v163_v5  ;;  %306 = vmatpush.msra.mxu2 %v1940_v2  ;;  %v1980_v10 = vld [vmem:[%s2480_s5 + $0x20] sm:$0xff]  ;;  %v1988_v11 = vld [vmem:[%s2480_s5 + $0x10] sm:$0xff]  ;;  %s1479_s19 = sld [smem:[#allocation4 + $0x2]]  ;;  %v2094_v54 = vld [vmem:[%s2480_s5 + $0x58] sm:$0xff] }
  0x1b   :  { %237 = vmatpush.msra.mxu1 %v1950_v4  ;;  %s1480_s20 = sld [smem:[#allocation4 + $0x82]]  ;;  %v2036_v20 = vld [vmem:[%s2480_s5] sm:$0xff]  ;;  %326 = vmatpush.msra.mxu3 %v2087_v53  ;;  %v2101_v55 = vld [vmem:[%s2480_s5 + $0x48] sm:$0xff]  ;;  %v2108_v56 = vld [vmem:[%s2480_s5 + $0x38] sm:$0xff] }
  0x1c   :  { %187 = vmatpush.msra.mxu0 %v162_v6  ;;  %307 = vmatpush.msra.mxu2 %v1950_v4  ;;  %s1481_s21 = sld [smem:[#allocation4 + $0x3]]  ;;  %s93_s25 = scalar_lea.vmem %s2478_s3, %s92_s15  ;;  %v213_v21 = vld [vmem:[#allocation8] sm:$0x3]  ;;  %v2067_v26 = vld [vmem:[#allocation9] ss:$0 sm:$0xff]  ;;  %v2115_v57 = vld [vmem:[%s2480_s5 + $0x28] sm:$0xff] }
  0x1d   :  { %238 = vmatpush.msra.mxu1 %v1963_v7  ;;  %s1482_s22 = sld [smem:[#allocation4 + $0x83]]  ;;  %s98_s27 = scalar_lea.vmem %s2478_s3, %s1476_s16  ;;  %v94_v12 = vld [vmem:[%s93_s25] sm:$0x1]  ;;  %269 = vrot.lane.b32.xlu1 %v213_v21, %s1846_s29  ;;  %v2122_v58 = vld [vmem:[%s2480_s5 + $0x18] sm:$0xff]  ;;  %v2132_v61 = vld [vmem:[%s2480_s5 + $0x8] sm:$0xff] }
  0x1e   :  { %188 = vmatpush.msra.mxu0 %v161_v8  ;;  %308 = vmatpush.msra.mxu2 %v1963_v7  ;;  %s102_s11 = scalar_lea.vmem %s2478_s3, %s1477_s17  ;;  %v99_v13 = vld [vmem:[%s98_s27] sm:$0x1]  ;;  %96 = vst.msk [vmem:[#allocation2] sm:$0x1] %vm95_vm0, %v94_v12  ;;  %v217_v62 = vld [vmem:[#allocation8 + $0x2] sm:$0x3] }
  0x1f   :  { %239 = vmatpush.msra.mxu1 %v1973_v9  ;;  %s106_s4 = scalar_lea.vmem %s2478_s3, %s1478_s18  ;;  %v103_v14 = vld [vmem:[%s102_s11] sm:$0x1]  ;;  %100 = vst.msk [vmem:[#allocation2 + $0x1] sm:$0x1] %vm95_vm0, %v99_v13  ;;  %327 = vmatpush.msra.mxu3 %v2094_v54  ;;  %v2173_v3 = vld [vmem:[#allocation9 + $0x1] ss:$0 sm:$0xff] }
  0x20   :  { %452 = vmatpush.msrb.mxu0 %v1935_v1  ;;  %309 = vmatpush.msra.mxu2 %v1973_v9  ;;  %s110_s2 = scalar_lea.vmem %s2478_s3, %s1479_s19  ;;  %v107_v15 = vld [vmem:[%s106_s4] sm:$0x1]  ;;  %104 = vst.msk [vmem:[#allocation2 + $0x2] sm:$0x1] %vm95_vm0, %v103_v14  ;;  %s1483_s5 = sld [smem:[#allocation4 + $0x4]] }
  0x21   :  { %240 = vmatpush.msra.mxu1 %v1980_v10  ;;  %s114_s24 = scalar_lea.vmem %s2478_s3, %s1480_s20  ;;  %v111_v16 = vld [vmem:[%s110_s2] sm:$0x1]  ;;  %108 = vst.msk [vmem:[#allocation2 + $0x3] sm:$0x1] %vm95_vm0, %v107_v15  ;;  %328 = vmatpush.msra.mxu3 %v2101_v55  ;;  %s1484_s12 = sld [smem:[#allocation4 + $0x84]] }
  0x22   :  { %453 = vmatpush.msrb.mxu0 %v1940_v2  ;;  %310 = vmatpush.msra.mxu2 %v1980_v10  ;;  %s118_s6 = scalar_lea.vmem %s2478_s3, %s1481_s21  ;;  %v115_v17 = vld [vmem:[%s114_s24] sm:$0x1]  ;;  %112 = vst.msk [vmem:[#allocation2 + $0x4] sm:$0x1] %vm95_vm0, %v111_v16  ;;  %s1485_s18 = sld [smem:[#allocation4 + $0x5]] }
  0x23   :  { %241 = vmatpush.msra.mxu1 %v1988_v11  ;;  %s122_s19 = scalar_lea.vmem %s2478_s3, %s1482_s22  ;;  %v119_v18 = vld [vmem:[%s118_s6] sm:$0x1]  ;;  %116 = vst.msk [vmem:[#allocation2 + $0x5] sm:$0x1] %vm95_vm0, %v115_v17  ;;  %329 = vmatpush.msra.mxu3 %v2108_v56  ;;  %s1487_s2 = sld [smem:[#allocation4 + $0x6]] }
  0x24   :  { %454 = vmatpush.msrb.mxu0 %v1950_v4  ;;  %311 = vmatpush.msra.mxu2 %v1988_v11  ;;  %v123_v19 = vld [vmem:[%s122_s19] sm:$0x1]  ;;  %120 = vst.msk [vmem:[#allocation2 + $0x6] sm:$0x1] %vm95_vm0, %v119_v18  ;;  %s1486_s19 = sld [smem:[#allocation4 + $0x85]]  ;;  %s1410_s24 = sshll.u32 %s2483_s8, 4  ;;  %s1411_s24 = int_to_ptr.hbm [resolvable:$true] %s1410_s24 }
  0x25   :  { %124 = vst.msk [vmem:[#allocation2 + $0x7] sm:$0x1] %vm95_vm0, %v123_v19  ;;  %242 = vmatpush.msra.mxu1 %v2036_v20  ;;  %v212_v23 = vld [vmem:[%s2476_s1] sm:$0x3]  ;;  %s1851_s1 = smov 64   ;;  %330 = vmatpush.msra.mxu3 %v2115_v57  ;;  %s1488_s20 = sld [smem:[#allocation4 + $0x86]] }
  0x26   :  { %455 = vmatpush.msrb.mxu0 %v1963_v7  ;;  %312 = vmatpush.msra.mxu2 %v2036_v20  ;;  %s1489_s21 = sld [smem:[#allocation4 + $0x7]]  ;;  %s126_s27 = scalar_lea.vmem %s2478_s3, %s1483_s5 }
  0x27   :  { %472 = vmatpush.msrb.mxu1 %v2082_v52  ;;  %331 = vmatpush.msra.mxu3 %v2122_v58  ;;  %s1490_s22 = sld [smem:[#allocation4 + $0x87]]  ;;  %s130_s11 = scalar_lea.vmem %s2478_s3, %s1484_s12 }
  0x28   :  { %456 = vmatpush.msrb.mxu0 %v1973_v9  ;;  %593 = vmatpush.msrb.mxu2 %v1935_v1  ;;  %s134_s4 = scalar_lea.vmem %s2478_s3, %s1485_s18  ;;  %s2489_s16 = smov 128  }
  0x29   :  { %473 = vmatpush.msrb.mxu1 %v2087_v53  ;;  %332 = vmatpush.msra.mxu3 %v2132_v61  ;;  %s142_s17 = scalar_lea.vmem %s2478_s3, %s1487_s2 }
  0x2a   :  { %457 = vmatpush.msrb.mxu0 %v1980_v10  ;;  %594 = vmatpush.msrb.mxu2 %v1940_v2  ;;  %s138_s23 = scalar_lea.vmem %s2478_s3, %s1486_s19 }
  0x2b   :  { %474 = vmatpush.msrb.mxu1 %v2094_v54  ;;  %613 = vmatpush.msrb.mxu3 %v2082_v52  ;;  %s146_s25 = scalar_lea.vmem %s2478_s3, %s1488_s20 }
  0x2c   :  { %458 = vmatpush.msrb.mxu0 %v1988_v11  ;;  %v159_v22 = vld [vmem:[#allocation2] sm:$0xff]  ;;  %595 = vmatpush.msrb.mxu2 %v1950_v4  ;;  %s150_s26 = scalar_lea.vmem %s2478_s3, %s1489_s21 }
  0x2d   :  { %1491 = vmatmul.msk.f32.vlgmr.msra.gmra.mxu0 %vm166_vm1, %v159_v22  ;;  %475 = vmatpush.msrb.mxu1 %v2101_v55  ;;  %s154_s2 = scalar_lea.vmem %s2478_s3, %s1490_s22  ;;  %s1852_s3 = smov 96  }
  0x2e   :  { %459 = vmatpush.msrb.mxu0 %v2036_v20  ;;  %596 = vmatpush.msrb.mxu2 %v1963_v7 }
  0x2f   :  { %476 = vmatpush.msrb.mxu1 %v2108_v56  ;;  %614 = vmatpush.msrb.mxu3 %v2087_v53 }
  0x30   :  { %734 = vmatpush.msra.mxu0 %v1935_v1  ;;  %597 = vmatpush.msrb.mxu2 %v1973_v9 }
  0x31   :  { %477 = vmatpush.msrb.mxu1 %v2115_v57  ;;  %615 = vmatpush.msrb.mxu3 %v2094_v54 }
  0x32   :  { %735 = vmatpush.msra.mxu0 %v1940_v2  ;;  %598 = vmatpush.msrb.mxu2 %v1980_v10 }
  0x33   :  { %478 = vmatpush.msrb.mxu1 %v2122_v58  ;;  %616 = vmatpush.msrb.mxu3 %v2101_v55 }
  0x34   :  { %736 = vmatpush.msra.mxu0 %v1950_v4  ;;  %599 = vmatpush.msrb.mxu2 %v1988_v11 }
  0x35   :  { %479 = vmatpush.msrb.mxu1 %v2132_v61  ;;  %617 = vmatpush.msrb.mxu3 %v2108_v56 }
  0x36   :  { %737 = vmatpush.msra.mxu0 %v1963_v7  ;;  %600 = vmatpush.msrb.mxu2 %v2036_v20 }
  0x37   :  { %618 = vmatpush.msrb.mxu3 %v2115_v57 }
  0x38   :  { %738 = vmatpush.msra.mxu0 %v1973_v9 }
  0x39   :  { %619 = vmatpush.msrb.mxu3 %v2122_v58 }
  0x3a   :  { %739 = vmatpush.msra.mxu0 %v1980_v10 }
  0x3b   :  { %620 = vmatpush.msrb.mxu3 %v2132_v61 }
  0x3c   :  { %740 = vmatpush.msra.mxu0 %v1988_v11 }
  0x3e   :  { %741 = vmatpush.msra.mxu0 %v2036_v20 }
  0x89   :  { %v2062_v24 = vpop.permute.xlu0 %219 }
  0x8a   :  { %v222_v25 = vsel %vm166_vm1, %v212_v23, %v2062_v24 }
  0x8b   :  { %1494 = vmatmul.msk.f32.vlgmr.msra.gmra.mxu1 %vm223_vm2, %v222_v25 }
  0x8c   :  { %754 = vmatpush.msra.mxu1 %v2082_v52 }
  0x8e   :  { %755 = vmatpush.msra.mxu1 %v2087_v53 }
  0x8f   :  { %v270_v47 = vpop.permute.xlu1 %269 }
  0x90   :  { %756 = vmatpush.msra.mxu1 %v2094_v54 }
  0x92   :  { %757 = vmatpush.msra.mxu1 %v2101_v55 }
  0x94   :  { %758 = vmatpush.msra.mxu1 %v2108_v56 }
  0x96   :  { %759 = vmatpush.msra.mxu1 %v2115_v57 }
  0x98   :  { %760 = vmatpush.msra.mxu1 %v2122_v58 }
  0x9a   :  { %761 = vmatpush.msra.mxu1 %v2132_v61 }
  0xaa   :  { %v190_v27 = vpop.f32.mrf.mxu0 }
  0xab   :  { %v2070_v28 = vadd.f32 %v2067_v26, %v190_v27 }
 0x108   :  { %v244_v29 = vpop.f32.mrf.mxu1 }
 0x109   :  { %v247_v30 = vadd.f32 %v244_v29, %v2070_v28 }
 0x10b   :  { %1548 = vtanh.f32 %v247_v30  ;;  %v1495_v32 = vmul.f32 -1.442695, %v247_v30 }
 0x10d   :  { %1550 = vpow2.f32 %v1495_v32 }
 0x111   :  { %v1549_v31 = vpop.eup %1548 }
 0x112   :  { %274 = vrot.lane.b32.xlu0 %v1549_v31, %s1851_s1 }
 0x113   :  { %v1551_v33 = vpop.eup %1550 }
 0x114   :  { %v251_v34 = vadd.f32 1.0, %v1551_v33 }
 0x116   :  { %1552 = vrcp.f32 %v251_v34  ;;  %v263_v40 = vand.u32 2147483648, %v251_v34  ;;  %vm257_vm4 = vweird.f32 %v251_v34  ;;  %v261_v41 = vand.u32 2147483647, %v251_v34 }
 0x118   :  { %v264_v43 = vor.u32 1.1754944e-38, %v263_v40  ;;  %vm262_vm6 = vcmp.eq.f32.partialorder %v261_v41, 8.507059e+37 }
 0x11c   :  { %v1553_v35 = vpop.eup %1552 }
 0x11d   :  { %v253_v36 = vmul.f32 %v1553_v35, %v251_v34  ;;  %vm258_vm3 = vweird.f32 %v1553_v35 }
 0x11e   :  { %vm259_vm5 = vmor %vm257_vm4, %vm258_vm3 }
 0x11f   :  { %v254_v37 = vsub.f32 1.0, %v253_v36 }
 0x121   :  { %v255_v38 = vmul.f32 %v1553_v35, %v254_v37 }
 0x123   :  { %v256_v39 = vadd.f32 %v1553_v35, %v255_v38 }
 0x125   :  { %v260_v42 = vsel %vm259_vm5, %v1553_v35, %v256_v39 }
 0x126   :  { %v265_v44 = vsel %vm262_vm6, %v264_v43, %v260_v42 }
 0x127   :  { %v272_v48 = vmul.f32 %v270_v47, %v265_v44 }
 0x184   :  { %v275_v45 = vpop.permute.xlu0 %274 }
 0x185   :  { %v277_v46 = vmul.f32 %v275_v45, %v265_v44 }
 0x187   :  { %279 = vrot.lane.b32.xlu1 %v277_v46, %s1846_s29 }
 0x1f9   :  { %v280_v49 = vpop.permute.xlu1 %279 }
 0x1fa   :  { %v2075_v50 = vadd.f32 %v280_v49, %v272_v48 }
 0x1fc   :  { %1554 = vtanh.f32 %v2075_v50 }
 0x202   :  { %v1555_v51 = vpop.eup %1554 }
 0x203   :  { %285 = vrot.lane.b32.xlu2 %v1555_v51, %s1851_s1  ;;  %v362_v51 = vrot.slane %v2075_v50, 6 }
 0x25d   :  { %v286_v59 = vpop.permute.xlu2 %285 }
 0x25e   :  { %v288_v60 = vmul.f32 %v286_v59, %v265_v44 }
 0x260   :  { %290 = vrot.lane.b32.xlu2 %v288_v60, %s1846_s29 }
 0x268   :  { %404 = vrot.lane.b32.xlu2 %v217_v62, %s1846_s29 }
 0x2ba   :  { %v291_v63 = vpop.permute.xlu2 %290 }
 0x2bb   :  { %v293_v0 = vsel %vm166_vm1, %v291_v63, %v2062_v24 }
 0x2bc   :  { %1496 = vmatmul.msk.f32.vlgmr.msra.gmra.mxu2 %vm223_vm2, %v293_v0  ;;  %1497 = vmatmul.msk.f32.vlgmr.msra.gmra.mxu3 %vm223_vm2, %v293_v0 }
 0x2bd   :  { %870 = vmatpush.msra.mxu2 %v1935_v1  ;;  %890 = vmatpush.msra.mxu3 %v2082_v52 }
 0x2bf   :  { %871 = vmatpush.msra.mxu2 %v1940_v2  ;;  %891 = vmatpush.msra.mxu3 %v2087_v53 }
 0x2c1   :  { %872 = vmatpush.msra.mxu2 %v1950_v4  ;;  %892 = vmatpush.msra.mxu3 %v2094_v54 }
 0x2c2   :  { %v405_v49 = vpop.permute.xlu2 %404 }
 0x2c3   :  { %873 = vmatpush.msra.mxu2 %v1963_v7  ;;  %893 = vmatpush.msra.mxu3 %v2101_v55 }
 0x2c5   :  { %874 = vmatpush.msra.mxu2 %v1973_v9  ;;  %894 = vmatpush.msra.mxu3 %v2108_v56 }
 0x2c7   :  { %875 = vmatpush.msra.mxu2 %v1980_v10  ;;  %895 = vmatpush.msra.mxu3 %v2115_v57 }
 0x2c9   :  { %876 = vmatpush.msra.mxu2 %v1988_v11  ;;  %896 = vmatpush.msra.mxu3 %v2122_v58 }
 0x2cb   :  { %877 = vmatpush.msra.mxu2 %v2036_v20  ;;  %897 = vmatpush.msra.mxu3 %v2132_v61 }
 0x33f   :  { %v314_v5 = vpop.f32.mrf.mxu2  ;;  %v334_v6 = vpop.f32.mrf.mxu3 }
 0x340   :  { %v338_v8 = vrot.slane %v314_v5, 6  ;;  %v382_v12 = vadd.f32 %v2173_v3, %v334_v6 }
 0x342   :  { %v340_v13 = vadd.f32 %v338_v8, %v2070_v28  ;;  %1556 = vtanh.f32 %v382_v12  ;;  %v1499_v16 = vmul.f32 -1.442695, %v382_v12 }
 0x344   :  { %1558 = vtanh.f32 %v340_v13  ;;  %v1498_v17 = vmul.f32 -1.442695, %v340_v13 }
 0x345   :  { %1560 = vpow2.f32 %v1499_v16  ;;  %v127_v16 = vld [vmem:[%s126_s27] sm:$0x1]  ;;  %s1423_s27 = sshll.u32 %s2484_s9, 4  ;;  %s1855_s9 = smov [#allocation12]   ;;  %s1424_s27 = int_to_ptr.hbm [resolvable:$true] %s1423_s27 }
 0x346   :  { %1562 = vpow2.f32 %v1498_v17  ;;  %v131_v17 = vld [vmem:[%s130_s11] sm:$0x1]  ;;  %128 = vst.msk [vmem:[#allocation2 + $0x8] sm:$0x1] %vm95_vm0, %v127_v16  ;;  %s1434_s11 = sshll.u32 %s1854_s0, 4  ;;  %s1408_s14 = sshll.u32 %s1855_s9, 4  ;;  %s1435_s11 = int_to_ptr.vmem [resolvable:$true] %s1434_s11  ;;  %s1409_s14 = int_to_ptr.vmem [resolvable:$true] %s1408_s14 }
 0x347   :  { %132 = vst.msk [vmem:[#allocation2 + $0x9] sm:$0x1] %vm95_vm0, %v131_v17 }
 0x348   :  { %v1557_v14 = vpop.eup %1556 }
 0x349   :  { %409 = vrot.lane.b32.xlu0 %v1557_v14, %s1851_s1 }
 0x34a   :  { %v1559_v15 = vpop.eup %1558 }
 0x34b   :  { %366 = vrot.lane.b32.xlu1 %v1559_v15, %s1851_s1  ;;  %v1561_v18 = vpop.eup %1560 }
 0x34c   :  { %v1563_v19 = vpop.eup %1562  ;;  %v386_v21 = vadd.f32 1.0, %v1561_v18  ;;  %v135_v18 = vld [vmem:[%s134_s4] sm:$0x1]  ;;  %s1436_s4 = sshll.u32 %s2485_s10, 4  ;;  %s2488_s10 = smov 8   ;;  %s1437_s4 = int_to_ptr.hbm [resolvable:$true] %s1436_s4 }
 0x34d   :  { %v344_v22 = vadd.f32 1.0, %v1563_v19  ;;  %v139_v19 = vld [vmem:[%s138_s23] sm:$0x1]  ;;  %136 = vst.msk [vmem:[#allocation2 + $0xa] sm:$0x1] %vm95_vm0, %v135_v18 }
 0x34e   :  { %1564 = vrcp.f32 %v386_v21  ;;  %v398_v34 = vand.u32 2147483648, %v386_v21  ;;  %vm392_vm8 = vweird.f32 %v386_v21  ;;  %v396_v35 = vand.u32 2147483647, %v386_v21  ;;  %140 = vst.msk [vmem:[#allocation2 + $0xb] sm:$0x1] %vm95_vm0, %v139_v19 }
 0x34f   :  { %1566 = vrcp.f32 %v344_v22  ;;  %v356_v37 = vand.u32 2147483648, %v344_v22  ;;  %vm350_vm11 = vweird.f32 %v344_v22  ;;  %v354_v39 = vand.u32 2147483647, %v344_v22 }
 0x350   :  { %v399_v40 = vor.u32 1.1754944e-38, %v398_v34  ;;  %vm397_vm13 = vcmp.eq.f32.partialorder %v396_v35, 8.507059e+37 }
 0x351   :  { %v357_v44 = vor.u32 1.1754944e-38, %v356_v37  ;;  %vm355_vm14 = vcmp.eq.f32.partialorder %v354_v39, 8.507059e+37 }
 0x354   :  { %v1565_v23 = vpop.eup %1564 }
 0x355   :  { %v1567_v24 = vpop.eup %1566  ;;  %v388_v25 = vmul.f32 %v1565_v23, %v386_v21  ;;  %vm393_vm7 = vweird.f32 %v1565_v23  ;;  %v143_v21 = vld [vmem:[%s142_s17] sm:$0x1] }
 0x356   :  { %v346_v27 = vmul.f32 %v1567_v24, %v344_v22  ;;  %vm351_vm9 = vweird.f32 %v1567_v24  ;;  %vm394_vm10 = vmor %vm392_vm8, %vm393_vm7  ;;  %v147_v22 = vld [vmem:[%s146_s25] sm:$0x1]  ;;  %144 = vst.msk [vmem:[#allocation2 + $0xc] sm:$0x1] %vm95_vm0, %v143_v21 }
 0x357   :  { %v389_v29 = vsub.f32 1.0, %v388_v25  ;;  %vm352_vm12 = vmor %vm350_vm11, %vm351_vm9  ;;  %148 = vst.msk [vmem:[#allocation2 + $0xd] sm:$0x1] %vm95_vm0, %v147_v22 }
 0x358   :  { %v347_v30 = vsub.f32 1.0, %v346_v27 }
 0x359   :  { %v390_v31 = vmul.f32 %v1565_v23, %v389_v29 }
 0x35a   :  { %v348_v32 = vmul.f32 %v1567_v24, %v347_v30 }
 0x35b   :  { %v391_v33 = vadd.f32 %v1565_v23, %v390_v31 }
 0x35c   :  { %v349_v36 = vadd.f32 %v1567_v24, %v348_v32 }
 0x35d   :  { %v395_v38 = vsel %vm394_vm10, %v1565_v23, %v391_v33  ;;  %v151_v23 = vld [vmem:[%s150_s26] sm:$0x1] }
 0x35e   :  { %v353_v41 = vsel %vm352_vm12, %v1567_v24, %v349_v36  ;;  %v400_v42 = vsel %vm397_vm13, %v399_v40, %v395_v38  ;;  %v155_v24 = vld [vmem:[%s154_s2] sm:$0x1]  ;;  %152 = vst.msk [vmem:[#allocation2 + $0xe] sm:$0x1] %vm95_vm0, %v151_v23 }
 0x35f   :  { %v358_v47 = vsel %vm355_vm14, %v357_v44, %v353_v41  ;;  %v407_v59 = vmul.f32 %v405_v49, %v400_v42  ;;  %156 = vst.msk [vmem:[#allocation2 + $0xf] sm:$0x1] %vm95_vm0, %v155_v24 }
 0x360   :  { %v364_v63 = vmul.f32 %v362_v51, %v358_v47 }
 0x366   :  { %v160_v25 = vld [vmem:[#allocation2 + $0x8] sm:$0xff] }
 0x367   :  { %1492 = vmatmul.msk.f32.gmra.mxu0 %vm166_vm1, %v160_v25 }
 0x3bb   :  { %v410_v43 = vpop.permute.xlu0 %409 }
 0x3bc   :  { %v412_v45 = vmul.f32 %v410_v43, %v400_v42 }
 0x3bd   :  { %v367_v46 = vpop.permute.xlu1 %366 }
 0x3be   :  { %v369_v48 = vmul.f32 %v367_v46, %v358_v47  ;;  %414 = vrot.lane.b32.xlu0 %v412_v45, %s1846_s29 }
 0x3c0   :  { %371 = vrot.lane.b32.xlu1 %v369_v48, %s1846_s29 }
 0x3e4   :  { %v2247_v32 = vpop.f32.mrf.mxu0 }
 0x430   :  { %v415_v60 = vpop.permute.xlu0 %414 }
 0x431   :  { %v2182_v62 = vadd.f32 %v415_v60, %v407_v59 }
 0x432   :  { %v372_v0 = vpop.permute.xlu1 %371 }
 0x433   :  { %1568 = vtanh.f32 %v2182_v62  ;;  %v2185_v5 = vadd.f32 %v372_v0, %v364_v63 }
 0x435   :  { %1570 = vtanh.f32 %v2185_v5 }
 0x439   :  { %v1569_v6 = vpop.eup %1568 }
 0x43a   :  { %420 = vrot.lane.b32.xlu2 %v1569_v6, %s1851_s1 }
 0x43b   :  { %v1571_v8 = vpop.eup %1570 }
 0x43c   :  { %377 = vrot.lane.b32.xlu0 %v1571_v8, %s1851_s1 }
 0x494   :  { %v421_v12 = vpop.permute.xlu2 %420 }
 0x495   :  { %v2190_v50 = vmul.f32 %v421_v12, %v400_v42 }
 0x497   :  { %v435_v13 = vrot.slane %v2190_v50, 6 }
 0x499   :  { %436 = vrot.lane.b32.xlu2 %v435_v13, %s1851_s1 }
 0x4ae   :  { %v378_v14 = vpop.permute.xlu0 %377 }
 0x4af   :  { %v380_v15 = vmul.f32 %v378_v14, %v358_v47 }
 0x4b1   :  { %432 = vrot.lane.b32.xlu1 %v380_v15, %s1846_s29 }
 0x4f3   :  { %v437_v27 = vpop.permute.xlu2 %436 }
 0x523   :  { %v433_v29 = vpop.permute.xlu1 %432 }
 0x524   :  { %v439_v30 = vsel %vm166_vm1, %v433_v29, %v437_v27 }
 0x525   :  { %v441_v31 = vrot.slane %v439_v30, 2 }
 0x527   :  { %1500 = vmatmul.msk.f32.vlgmr.msrb.gmra.mxu0 %vm223_vm2, %v441_v31  ;;  %1501 = vmatmul.msk.f32.vlgmr.msrb.gmra.mxu1 %vm223_vm2, %v441_v31 }
 0x528   :  { %1011 = vmatpush.msrb.mxu0 %v1935_v1  ;;  %1031 = vmatpush.msrb.mxu1 %v2082_v52 }
 0x52a   :  { %1012 = vmatpush.msrb.mxu0 %v1940_v2  ;;  %1032 = vmatpush.msrb.mxu1 %v2087_v53 }
 0x52c   :  { %1013 = vmatpush.msrb.mxu0 %v1950_v4  ;;  %1033 = vmatpush.msrb.mxu1 %v2094_v54 }
 0x52e   :  { %1014 = vmatpush.msrb.mxu0 %v1963_v7  ;;  %1034 = vmatpush.msrb.mxu1 %v2101_v55 }
 0x530   :  { %1015 = vmatpush.msrb.mxu0 %v1973_v9  ;;  %1035 = vmatpush.msrb.mxu1 %v2108_v56 }
 0x532   :  { %1016 = vmatpush.msrb.mxu0 %v1980_v10  ;;  %1036 = vmatpush.msrb.mxu1 %v2115_v57 }
 0x534   :  { %1017 = vmatpush.msrb.mxu0 %v1988_v11  ;;  %1037 = vmatpush.msrb.mxu1 %v2122_v58 }
 0x536   :  { %1018 = vmatpush.msrb.mxu0 %v2036_v20  ;;  %1038 = vmatpush.msrb.mxu1 %v2132_v61 }
 0x5a4   :  { %v461_v33 = vpop.f32.mrf.mxu0  ;;  %v481_v34 = vpop.f32.mrf.mxu1 }
 0x5a5   :  { %v485_v35 = vrot.slane %v461_v33, 4  ;;  %v528_v36 = vadd.f32 %v2173_v3, %v481_v34  ;;  %v509_v33 = vrot.slane %v2185_v5, 6 }
 0x5a7   :  { %v487_v37 = vadd.f32 %v485_v35, %v2070_v28  ;;  %1572 = vtanh.f32 %v528_v36  ;;  %v1503_v40 = vmul.f32 -1.442695, %v528_v36 }
 0x5a9   :  { %1574 = vtanh.f32 %v487_v37  ;;  %v1502_v41 = vmul.f32 -1.442695, %v487_v37 }
 0x5aa   :  { %1576 = vpow2.f32 %v1503_v40 }
 0x5ab   :  { %1578 = vpow2.f32 %v1502_v41 }
 0x5ad   :  { %v1573_v38 = vpop.eup %1572 }
 0x5ae   :  { %551 = vrot.lane.b32.xlu0 %v1573_v38, %s1851_s1 }
 0x5af   :  { %v1575_v39 = vpop.eup %1574 }
 0x5b0   :  { %513 = vrot.lane.b32.xlu1 %v1575_v39, %s1851_s1  ;;  %v1577_v42 = vpop.eup %1576 }
 0x5b1   :  { %v1579_v43 = vpop.eup %1578  ;;  %v532_v44 = vadd.f32 1.0, %v1577_v42 }
 0x5b2   :  { %v491_v45 = vadd.f32 1.0, %v1579_v43 }
 0x5b3   :  { %1580 = vrcp.f32 %v532_v44  ;;  %v544_v6 = vand.u32 2147483648, %v532_v44  ;;  %vm538_vm3 = vweird.f32 %v532_v44  ;;  %v542_v8 = vand.u32 2147483647, %v532_v44 }
 0x5b4   :  { %1582 = vrcp.f32 %v491_v45  ;;  %v503_v13 = vand.u32 2147483648, %v491_v45  ;;  %vm497_vm6 = vweird.f32 %v491_v45  ;;  %v501_v15 = vand.u32 2147483647, %v491_v45 }
 0x5b5   :  { %v545_v16 = vor.u32 1.1754944e-38, %v544_v6  ;;  %vm543_vm8 = vcmp.eq.f32.partialorder %v542_v8, 8.507059e+37 }
 0x5b6   :  { %v504_v21 = vor.u32 1.1754944e-38, %v503_v13  ;;  %vm502_vm9 = vcmp.eq.f32.partialorder %v501_v15, 8.507059e+37 }
 0x5b9   :  { %v1581_v46 = vpop.eup %1580 }
 0x5ba   :  { %v1583_v47 = vpop.eup %1582  ;;  %v534_v48 = vmul.f32 %v1581_v46, %v532_v44  ;;  %vm539_vm15 = vweird.f32 %v1581_v46 }
 0x5bb   :  { %v493_v49 = vmul.f32 %v1583_v47, %v491_v45  ;;  %vm498_vm4 = vweird.f32 %v1583_v47  ;;  %vm540_vm5 = vmor %vm538_vm3, %vm539_vm15 }
 0x5bc   :  { %v535_v51 = vsub.f32 1.0, %v534_v48  ;;  %vm499_vm7 = vmor %vm497_vm6, %vm498_vm4 }
 0x5bd   :  { %v494_v59 = vsub.f32 1.0, %v493_v49 }
 0x5be   :  { %v536_v60 = vmul.f32 %v1581_v46, %v535_v51 }
 0x5bf   :  { %v495_v63 = vmul.f32 %v1583_v47, %v494_v59 }
 0x5c0   :  { %v537_v0 = vadd.f32 %v1581_v46, %v536_v60 }
 0x5c1   :  { %v496_v12 = vadd.f32 %v1583_v47, %v495_v63 }
 0x5c2   :  { %v541_v14 = vsel %vm540_vm5, %v1581_v46, %v537_v0 }
 0x5c3   :  { %v500_v17 = vsel %vm499_vm7, %v1583_v47, %v496_v12  ;;  %v546_v19 = vsel %vm543_vm8, %v545_v16, %v541_v14 }
 0x5c4   :  { %v505_v24 = vsel %vm502_vm9, %v504_v21, %v500_v17  ;;  %v549_v27 = vmul.f32 %v546_v19, %v2182_v62 }
 0x5c5   :  { %v511_v34 = vmul.f32 %v509_v33, %v505_v24 }
 0x620   :  { %v552_v18 = vpop.permute.xlu0 %551 }
 0x621   :  { %v554_v22 = vmul.f32 %v552_v18, %v546_v19 }
 0x622   :  { %v514_v23 = vpop.permute.xlu1 %513 }
 0x623   :  { %v516_v25 = vmul.f32 %v514_v23, %v505_v24  ;;  %556 = vrot.lane.b32.xlu2 %v554_v22, %s1846_s29 }
 0x625   :  { %518 = vrot.lane.b32.xlu0 %v516_v25, %s1846_s29 }
 0x67d   :  { %v557_v29 = vpop.permute.xlu2 %556 }
 0x67e   :  { %v2256_v30 = vadd.f32 %v557_v29, %v549_v27 }
 0x680   :  { %1584 = vtanh.f32 %v2256_v30 }
 0x686   :  { %v1585_v31 = vpop.eup %1584 }
 0x687   :  { %562 = vrot.lane.b32.xlu1 %v1585_v31, %s1851_s1 }
 0x697   :  { %v519_v35 = vpop.permute.xlu0 %518 }
 0x698   :  { %v2261_v36 = vadd.f32 %v519_v35, %v511_v34 }
 0x69a   :  { %1586 = vtanh.f32 %v2261_v36  ;;  %v650_v33 = vrot.slane %v2261_v36, 6 }
 0x6a0   :  { %v1587_v37 = vpop.eup %1586 }
 0x6a1   :  { %524 = vrot.lane.b32.xlu2 %v1587_v37, %s1851_s1 }
 0x6f9   :  { %v563_v62 = vpop.permute.xlu1 %562 }
 0x6fa   :  { %v2265_v38 = vmul.f32 %v563_v62, %v546_v19 }
 0x6fb   :  { %v525_v39 = vpop.permute.xlu2 %524 }
 0x6fc   :  { %v576_v40 = vrot.slane %v2265_v38, 4  ;;  %v527_v41 = vmul.f32 %v525_v39, %v505_v24 }
 0x6fe   :  { %577 = vrot.lane.b32.xlu1 %v576_v40, %s1851_s1  ;;  %573 = vrot.lane.b32.xlu0 %v527_v41, %s1846_s29 }
 0x770   :  { %v578_v5 = vpop.permute.xlu1 %577  ;;  %v574_v42 = vpop.permute.xlu0 %573 }
 0x771   :  { %v580_v43 = vsel %vm166_vm1, %v574_v42, %v578_v5 }
 0x772   :  { %v582_v44 = vrot.slane %v580_v43, 4 }
 0x774   :  { %1504 = vmatmul.msk.f32.vlgmr.msrb.gmra.mxu2 %vm223_vm2, %v582_v44  ;;  %1505 = vmatmul.msk.f32.vlgmr.msrb.gmra.mxu3 %vm223_vm2, %v582_v44 }
 0x775   :  { %1152 = vmatpush.msrb.mxu2 %v1935_v1  ;;  %1172 = vmatpush.msrb.mxu3 %v2082_v52 }
 0x777   :  { %1153 = vmatpush.msrb.mxu2 %v1940_v2  ;;  %1173 = vmatpush.msrb.mxu3 %v2087_v53 }
 0x779   :  { %1154 = vmatpush.msrb.mxu2 %v1950_v4  ;;  %1174 = vmatpush.msrb.mxu3 %v2094_v54 }
 0x77b   :  { %1155 = vmatpush.msrb.mxu2 %v1963_v7  ;;  %1175 = vmatpush.msrb.mxu3 %v2101_v55 }
 0x77d   :  { %1156 = vmatpush.msrb.mxu2 %v1973_v9  ;;  %1176 = vmatpush.msrb.mxu3 %v2108_v56 }
 0x77f   :  { %1157 = vmatpush.msrb.mxu2 %v1980_v10  ;;  %1177 = vmatpush.msrb.mxu3 %v2115_v57 }
 0x781   :  { %1158 = vmatpush.msrb.mxu2 %v1988_v11  ;;  %1178 = vmatpush.msrb.mxu3 %v2122_v58 }
 0x783   :  { %1159 = vmatpush.msrb.mxu2 %v2036_v20  ;;  %1179 = vmatpush.msrb.mxu3 %v2132_v61 }
 0x7f7   :  { %v602_v1 = vpop.f32.mrf.mxu2  ;;  %v622_v2 = vpop.f32.mrf.mxu3 }
 0x7f8   :  { %v626_v4 = vrot.slane %v602_v1, 2  ;;  %v669_v7 = vadd.f32 %v2173_v3, %v622_v2 }
 0x7fa   :  { %v628_v9 = vadd.f32 %v626_v4, %v2070_v28  ;;  %1588 = vtanh.f32 %v669_v7  ;;  %v1507_v11 = vmul.f32 -1.442695, %v669_v7 }
 0x7fc   :  { %1590 = vtanh.f32 %v628_v9  ;;  %v1506_v48 = vmul.f32 -1.442695, %v628_v9  ;;  %v2323_v9 = vadd.f32 %v2067_v26, %v2247_v32 }
 0x7fd   :  { %1592 = vpow2.f32 %v1507_v11 }
 0x800   :  { %v1589_v10 = vpop.eup %1588 }
 0x801   :  { %692 = vrot.lane.b32.xlu2 %v1589_v10, %s1851_s1 }
 0x802   :  { %v1591_v45 = vpop.eup %1590 }
 0x803   :  { %654 = vrot.lane.b32.xlu0 %v1591_v45, %s1851_s1  ;;  %v1593_v20 = vpop.eup %1592 }
 0x804   :  { %v673_v46 = vadd.f32 1.0, %v1593_v20 }
 0x806   :  { %1594 = vrcp.f32 %v673_v46  ;;  %v685_v0 = vand.u32 2147483648, %v673_v46  ;;  %vm679_vm11 = vweird.f32 %v673_v46  ;;  %v683_v6 = vand.u32 2147483647, %v673_v46 }
 0x807   :  { %1596 = vpow2.f32 %v1506_v48 }
 0x808   :  { %v686_v12 = vor.u32 1.1754944e-38, %v685_v0  ;;  %vm684_vm13 = vcmp.eq.f32.partialorder %v683_v6, 8.507059e+37 }
 0x80c   :  { %v1595_v47 = vpop.eup %1594 }
 0x80d   :  { %v675_v49 = vmul.f32 %v1595_v47, %v673_v46  ;;  %v1597_v28 = vpop.eup %1596  ;;  %vm680_vm10 = vweird.f32 %v1595_v47 }
 0x80e   :  { %v632_v63 = vadd.f32 1.0, %v1597_v28  ;;  %vm681_vm12 = vmor %vm679_vm11, %vm680_vm10 }
 0x80f   :  { %v676_v51 = vsub.f32 1.0, %v675_v49 }
 0x810   :  { %1598 = vrcp.f32 %v632_v63  ;;  %v644_v22 = vand.u32 2147483648, %v632_v63  ;;  %vm638_vm15 = vweird.f32 %v632_v63  ;;  %v642_v23 = vand.u32 2147483647, %v632_v63 }
 0x811   :  { %v677_v59 = vmul.f32 %v1595_v47, %v676_v51 }
 0x812   :  { %v645_v25 = vor.u32 1.1754944e-38, %v644_v22  ;;  %vm643_vm4 = vcmp.eq.f32.partialorder %v642_v23, 8.507059e+37 }
 0x813   :  { %v678_v60 = vadd.f32 %v1595_v47, %v677_v59 }
 0x815   :  { %v682_v8 = vsel %vm681_vm12, %v1595_v47, %v678_v60 }
 0x816   :  { %v687_v14 = vsel %vm684_vm13, %v686_v12, %v682_v8  ;;  %v1599_v16 = vpop.eup %1598 }
 0x817   :  { %v634_v17 = vmul.f32 %v1599_v16, %v632_v63  ;;  %vm639_vm14 = vweird.f32 %v1599_v16  ;;  %v690_v34 = vmul.f32 %v687_v14, %v2256_v30 }
 0x818   :  { %vm640_vm3 = vmor %vm638_vm15, %vm639_vm14 }
 0x819   :  { %v635_v18 = vsub.f32 1.0, %v634_v17 }
 0x81b   :  { %v636_v19 = vmul.f32 %v1599_v16, %v635_v18 }
 0x81d   :  { %v637_v21 = vadd.f32 %v1599_v16, %v636_v19 }
 0x81f   :  { %v641_v24 = vsel %vm640_vm3, %v1599_v16, %v637_v21 }
 0x820   :  { %v646_v29 = vsel %vm643_vm4, %v645_v25, %v641_v24 }
 0x821   :  { %v652_v62 = vmul.f32 %v650_v33, %v646_v29 }
 0x85b   :  { %v693_v13 = vpop.permute.xlu2 %692 }
 0x85c   :  { %v695_v15 = vmul.f32 %v693_v13, %v687_v14 }
 0x85e   :  { %697 = vrot.lane.b32.xlu1 %v695_v15, %s1846_s29 }
 0x875   :  { %v655_v27 = vpop.permute.xlu0 %654 }
 0x876   :  { %v657_v31 = vmul.f32 %v655_v27, %v646_v29 }
 0x878   :  { %659 = vrot.lane.b32.xlu2 %v657_v31, %s1846_s29 }
 0x8d0   :  { %v698_v35 = vpop.permute.xlu1 %697 }
 0x8d1   :  { %v2297_v37 = vadd.f32 %v698_v35, %v690_v34 }
 0x8d2   :  { %v660_v39 = vpop.permute.xlu2 %659 }
 0x8d3   :  { %1600 = vtanh.f32 %v2297_v37  ;;  %v2300_v40 = vadd.f32 %v660_v39, %v652_v62 }
 0x8d5   :  { %1602 = vtanh.f32 %v2300_v40 }
 0x8d9   :  { %v1601_v41 = vpop.eup %1600 }
 0x8da   :  { %703 = vrot.lane.b32.xlu0 %v1601_v41, %s1851_s1 }
 0x8db   :  { %v1603_v5 = vpop.eup %1602 }
 0x8dc   :  { %665 = vrot.lane.b32.xlu1 %v1603_v5, %s1851_s1 }
 0x94c   :  { %v704_v36 = vpop.permute.xlu0 %703 }
 0x94d   :  { %v2305_v42 = vmul.f32 %v704_v36, %v687_v14 }
 0x94e   :  { %v666_v30 = vpop.permute.xlu1 %665 }
 0x94f   :  { %v717_v43 = vrot.slane %v2305_v42, 2  ;;  %v668_v44 = vmul.f32 %v666_v30, %v646_v29  ;;  %v788_v29 = vrot.slane %v2300_v40, 6 }
 0x951   :  { %718 = vrot.lane.b32.xlu0 %v717_v43, %s1851_s1  ;;  %714 = vrot.lane.b32.xlu2 %v668_v44, %s1846_s29 }
 0x9ab   :  { %v715_v1 = vpop.permute.xlu2 %714 }
 0x9c3   :  { %v719_v2 = vpop.permute.xlu0 %718 }
 0x9c4   :  { %v721_v4 = vsel %vm166_vm1, %v715_v1, %v719_v2 }
 0x9c5   :  { %v723_v7 = vrot.slane %v721_v4, 6 }
 0x9c7   :  { %1508 = vmatmul.msk.f32.vlgmr.msra.gmra.mxu0 %vm223_vm2, %v723_v7  ;;  %1509 = vmatmul.msk.f32.vlgmr.msra.gmra.mxu1 %vm223_vm2, %v723_v7 }
 0x9c8   :  { %1293 = vmatpush.msra.mxu0 %v2082_v52 }
 0x9ca   :  { %1294 = vmatpush.msra.mxu0 %v2087_v53 }
 0x9cc   :  { %1295 = vmatpush.msra.mxu0 %v2094_v54 }
 0x9ce   :  { %1296 = vmatpush.msra.mxu0 %v2101_v55 }
 0x9d0   :  { %1297 = vmatpush.msra.mxu0 %v2108_v56 }
 0x9d2   :  { %1298 = vmatpush.msra.mxu0 %v2115_v57 }
 0x9d4   :  { %1299 = vmatpush.msra.mxu0 %v2122_v58 }
 0x9d6   :  { %1300 = vmatpush.msra.mxu0 %v2132_v61 }
 0xa44   :  { %v743_v10 = vpop.f32.mrf.mxu0  ;;  %v763_v52 = vpop.f32.mrf.mxu1 }
 0xa45   :  { %v766_v53 = vadd.f32 %v743_v10, %v2323_v9  ;;  %v807_v54 = vadd.f32 %v2173_v3, %v763_v52 }
 0xa47   :  { %1604 = vtanh.f32 %v766_v53  ;;  %v1511_v57 = vmul.f32 -1.442695, %v807_v54  ;;  %v1510_v32 = vmul.f32 -1.442695, %v766_v53 }
 0xa48   :  { %1606 = vtanh.f32 %v807_v54 }
 0xa49   :  { %1608 = vpow2.f32 %v1511_v57 }
 0xa4d   :  { %v1605_v55 = vpop.eup %1604 }
 0xa4e   :  { %v1607_v56 = vpop.eup %1606  ;;  %792 = vrot.lane.b32.xlu1 %v1605_v55, %s1851_s1 }
 0xa4f   :  { %830 = vrot.lane.b32.xlu2 %v1607_v56, %s1851_s1  ;;  %v1609_v58 = vpop.eup %1608 }
 0xa50   :  { %v811_v61 = vadd.f32 1.0, %v1609_v58 }
 0xa52   :  { %1610 = vrcp.f32 %v811_v61  ;;  %v823_v49 = vand.u32 2147483648, %v811_v61  ;;  %vm817_vm6 = vweird.f32 %v811_v61  ;;  %v821_v51 = vand.u32 2147483647, %v811_v61 }
 0xa53   :  { %1612 = vpow2.f32 %v1510_v32 }
 0xa54   :  { %v824_v28 = vor.u32 1.1754944e-38, %v823_v49  ;;  %vm822_vm8 = vcmp.eq.f32.partialorder %v821_v51, 8.507059e+37 }
 0xa58   :  { %v1611_v26 = vpop.eup %1610 }
 0xa59   :  { %v813_v45 = vmul.f32 %v1611_v26, %v811_v61  ;;  %v1613_v20 = vpop.eup %1612  ;;  %vm818_vm5 = vweird.f32 %v1611_v26 }
 0xa5a   :  { %v770_v47 = vadd.f32 1.0, %v1613_v20  ;;  %vm819_vm7 = vmor %vm817_vm6, %vm818_vm5 }
 0xa5b   :  { %v814_v11 = vsub.f32 1.0, %v813_v45 }
 0xa5c   :  { %1614 = vrcp.f32 %v770_v47  ;;  %v782_v15 = vand.u32 2147483648, %v770_v47  ;;  %vm776_vm10 = vweird.f32 %v770_v47  ;;  %v780_v16 = vand.u32 2147483647, %v770_v47 }
 0xa5d   :  { %v815_v46 = vmul.f32 %v1611_v26, %v814_v11 }
 0xa5e   :  { %v783_v18 = vor.u32 1.1754944e-38, %v782_v15  ;;  %vm781_vm12 = vcmp.eq.f32.partialorder %v780_v16, 8.507059e+37 }
 0xa5f   :  { %v816_v48 = vadd.f32 %v1611_v26, %v815_v46 }
 0xa61   :  { %v820_v59 = vsel %vm819_vm7, %v1611_v26, %v816_v48 }
 0xa62   :  { %v825_v63 = vsel %vm822_vm8, %v824_v28, %v820_v59  ;;  %v1615_v0 = vpop.eup %1614 }
 0xa63   :  { %v772_v8 = vmul.f32 %v1615_v0, %v770_v47  ;;  %vm777_vm9 = vweird.f32 %v1615_v0  ;;  %v828_v23 = vmul.f32 %v825_v63, %v2297_v37 }
 0xa64   :  { %vm778_vm11 = vmor %vm776_vm10, %vm777_vm9 }
 0xa65   :  { %v773_v12 = vsub.f32 1.0, %v772_v8 }
 0xa67   :  { %v774_v13 = vmul.f32 %v1615_v0, %v773_v12 }
 0xa69   :  { %v775_v14 = vadd.f32 %v1615_v0, %v774_v13 }
 0xa6b   :  { %v779_v17 = vsel %vm778_vm11, %v1615_v0, %v775_v14 }
 0xa6c   :  { %v784_v21 = vsel %vm781_vm12, %v783_v18, %v779_v17 }
 0xa6d   :  { %v790_v31 = vmul.f32 %v788_v29, %v784_v21 }
 0xaa9   :  { %v831_v60 = vpop.permute.xlu2 %830 }
 0xaaa   :  { %v833_v6 = vmul.f32 %v831_v60, %v825_v63 }
 0xaac   :  { %835 = vrot.lane.b32.xlu1 %v833_v6, %s1846_s29 }
 0xac0   :  { %v793_v19 = vpop.permute.xlu1 %792 }
 0xac1   :  { %v795_v22 = vmul.f32 %v793_v19, %v784_v21 }
 0xac3   :  { %797 = vrot.lane.b32.xlu0 %v795_v22, %s1846_s29 }
 0xb1e   :  { %v836_v24 = vpop.permute.xlu1 %835 }
 0xb1f   :  { %v2332_v25 = vadd.f32 %v836_v24, %v828_v23 }
 0xb21   :  { %1616 = vtanh.f32 %v2332_v25 }
 0xb27   :  { %v1617_v27 = vpop.eup %1616 }
 0xb28   :  { %841 = vrot.lane.b32.xlu0 %v1617_v27, %s1851_s1 }
 0xb35   :  { %v798_v33 = vpop.permute.xlu0 %797 }
 0xb36   :  { %v2337_v34 = vadd.f32 %v798_v33, %v790_v31 }
 0xb38   :  { %1618 = vtanh.f32 %v2337_v34 }
 0xb3e   :  { %v1619_v35 = vpop.eup %1618 }
 0xb3f   :  { %803 = vrot.lane.b32.xlu2 %v1619_v35, %s1851_s1 }
 0xb99   :  { %v804_v37 = vpop.permute.xlu2 %803 }
 0xb9a   :  { %v842_v62 = vpop.permute.xlu0 %841  ;;  %v806_v39 = vmul.f32 %v804_v37, %v784_v21  ;;  %v927_v21 = vrot.slane %v2337_v34, 6 }
 0xb9b   :  { %v2341_v41 = vmul.f32 %v842_v62, %v825_v63 }
 0xb9c   :  { %852 = vrot.lane.b32.xlu1 %v806_v39, %s1846_s29 }
 0xb9d   :  { %855 = vrot.lane.b32.xlu2 %v2341_v41, %s1851_s1 }
 0xbf7   :  { %v856_v40 = vpop.permute.xlu2 %855 }
 0xc0e   :  { %v853_v5 = vpop.permute.xlu1 %852 }
 0xc0f   :  { %v858_v36 = vsel %vm166_vm1, %v853_v5, %v856_v40 }
 0xc10   :  { %1512 = vmatmul.msk.f32.vlgmr.msra.gmra.mxu2 %vm223_vm2, %v858_v36  ;;  %1513 = vmatmul.msk.f32.vlgmr.msra.gmra.mxu3 %vm223_vm2, %v858_v36 }
 0xc93   :  { %v879_v30 = vpop.f32.mrf.mxu2  ;;  %v899_v43 = vpop.f32.mrf.mxu3 }
 0xc94   :  { %v903_v44 = vrot.slane %v879_v30, 6  ;;  %v946_v1 = vadd.f32 %v2173_v3, %v899_v43 }
 0xc96   :  { %v905_v2 = vadd.f32 %v903_v44, %v2323_v9  ;;  %1620 = vtanh.f32 %v946_v1  ;;  %v1515_v10 = vmul.f32 -1.442695, %v946_v1 }
 0xc98   :  { %1622 = vtanh.f32 %v905_v2  ;;  %v1514_v52 = vmul.f32 -1.442695, %v905_v2 }
 0xc99   :  { %1624 = vpow2.f32 %v1515_v10 }
 0xc9a   :  { %1626 = vpow2.f32 %v1514_v52 }
 0xc9c   :  { %v1621_v4 = vpop.eup %1620 }
 0xc9d   :  { %969 = vrot.lane.b32.xlu0 %v1621_v4, %s1851_s1 }
 0xc9e   :  { %v1623_v7 = vpop.eup %1622 }
 0xc9f   :  { %931 = vrot.lane.b32.xlu1 %v1623_v7, %s1851_s1  ;;  %v1625_v53 = vpop.eup %1624 }
 0xca0   :  { %v1627_v54 = vpop.eup %1626  ;;  %v950_v55 = vadd.f32 1.0, %v1625_v53 }
 0xca1   :  { %v909_v56 = vadd.f32 1.0, %v1627_v54 }
 0xca2   :  { %1628 = vrcp.f32 %v950_v55  ;;  %v962_v47 = vand.u32 2147483648, %v950_v55  ;;  %vm956_vm14 = vweird.f32 %v950_v55  ;;  %v960_v48 = vand.u32 2147483647, %v950_v55 }
 0xca3   :  { %1630 = vrcp.f32 %v909_v56  ;;  %v921_v51 = vand.u32 2147483648, %v909_v56  ;;  %vm915_vm4 = vweird.f32 %v909_v56  ;;  %v919_v28 = vand.u32 2147483647, %v909_v56 }
 0xca4   :  { %v963_v60 = vor.u32 1.1754944e-38, %v962_v47  ;;  %vm961_vm6 = vcmp.eq.f32.partialorder %v960_v48, 8.507059e+37 }
 0xca5   :  { %v922_v8 = vor.u32 1.1754944e-38, %v921_v51  ;;  %vm920_vm7 = vcmp.eq.f32.partialorder %v919_v28, 8.507059e+37 }
 0xca8   :  { %v1629_v57 = vpop.eup %1628 }
 0xca9   :  { %v1631_v58 = vpop.eup %1630  ;;  %v952_v61 = vmul.f32 %v1629_v57, %v950_v55  ;;  %vm957_vm13 = vweird.f32 %v1629_v57 }
 0xcaa   :  { %v911_v26 = vmul.f32 %v1631_v58, %v909_v56  ;;  %vm916_vm15 = vweird.f32 %v1631_v58  ;;  %vm958_vm3 = vmor %vm956_vm14, %vm957_vm13 }
 0xcab   :  { %v953_v32 = vsub.f32 1.0, %v952_v61  ;;  %vm917_vm5 = vmor %vm915_vm4, %vm916_vm15 }
 0xcac   :  { %v912_v45 = vsub.f32 1.0, %v911_v26 }
 0xcad   :  { %v954_v11 = vmul.f32 %v1629_v57, %v953_v32 }
 0xcae   :  { %v913_v20 = vmul.f32 %v1631_v58, %v912_v45 }
 0xcaf   :  { %v955_v46 = vadd.f32 %v1629_v57, %v954_v11 }
 0xcb0   :  { %v914_v49 = vadd.f32 %v1631_v58, %v913_v20 }
 0xcb1   :  { %v959_v59 = vsel %vm958_vm3, %v1629_v57, %v955_v46 }
 0xcb2   :  { %v918_v63 = vsel %vm917_vm5, %v1631_v58, %v914_v49  ;;  %v964_v6 = vsel %vm961_vm6, %v963_v60, %v959_v59 }
 0xcb3   :  { %v923_v14 = vsel %vm920_vm7, %v922_v8, %v918_v63  ;;  %v967_v16 = vmul.f32 %v964_v6, %v2332_v25 }
 0xcb4   :  { %v929_v22 = vmul.f32 %v927_v21, %v923_v14 }
 0xd0f   :  { %v970_v0 = vpop.permute.xlu0 %969 }
 0xd10   :  { %v972_v12 = vmul.f32 %v970_v0, %v964_v6 }
 0xd11   :  { %v932_v13 = vpop.permute.xlu1 %931 }
 0xd12   :  { %v934_v15 = vmul.f32 %v932_v13, %v923_v14  ;;  %974 = vrot.lane.b32.xlu2 %v972_v12, %s1846_s29 }
 0xd14   :  { %936 = vrot.lane.b32.xlu0 %v934_v15, %s1846_s29 }
 0xd6c   :  { %v975_v17 = vpop.permute.xlu2 %974 }
 0xd6d   :  { %v2356_v18 = vadd.f32 %v975_v17, %v967_v16 }
 0xd6f   :  { %1632 = vtanh.f32 %v2356_v18 }
 0xd75   :  { %v1633_v19 = vpop.eup %1632 }
 0xd76   :  { %980 = vrot.lane.b32.xlu1 %v1633_v19, %s1851_s1 }
 0xd86   :  { %v937_v23 = vpop.permute.xlu0 %936 }
 0xd87   :  { %v2361_v24 = vadd.f32 %v937_v23, %v929_v22 }
 0xd89   :  { %1634 = vtanh.f32 %v2361_v24  ;;  %v1068_v12 = vrot.slane %v2361_v24, 6 }
 0xd8f   :  { %v1635_v27 = vpop.eup %1634 }
 0xd90   :  { %942 = vrot.lane.b32.xlu2 %v1635_v27, %s1851_s1 }
 0xde8   :  { %v981_v25 = vpop.permute.xlu1 %980 }
 0xde9   :  { %v2365_v29 = vmul.f32 %v981_v25, %v964_v6 }
 0xdea   :  { %v943_v31 = vpop.permute.xlu2 %942 }
 0xdeb   :  { %v994_v33 = vrot.slane %v2365_v29, 6  ;;  %v945_v35 = vmul.f32 %v943_v31, %v923_v14 }
 0xded   :  { %995 = vrot.lane.b32.xlu1 %v994_v33, %s1851_s1  ;;  %991 = vrot.lane.b32.xlu0 %v945_v35, %s1846_s29 }
 0xe5f   :  { %v996_v34 = vpop.permute.xlu1 %995  ;;  %v992_v37 = vpop.permute.xlu0 %991 }
 0xe60   :  { %v998_v62 = vsel %vm166_vm1, %v992_v37, %v996_v34 }
 0xe61   :  { %v1000_v39 = vrot.slane %v998_v62, 2 }
 0xe63   :  { %1516 = vmatmul.msk.f32.vlgmr.msrb.gmra.mxu0 %vm223_vm2, %v1000_v39  ;;  %1517 = vmatmul.msk.f32.vlgmr.msrb.gmra.mxu1 %vm223_vm2, %v1000_v39 }
 0xee0   :  { %v1020_v40 = vpop.f32.mrf.mxu0  ;;  %v1040_v5 = vpop.f32.mrf.mxu1 }
 0xee1   :  { %v1044_v36 = vrot.slane %v1020_v40, 4  ;;  %v1087_v30 = vadd.f32 %v2173_v3, %v1040_v5  ;;  %v2397_v40 = vld [vmem:[#allocation9 + $0x1] ss:$0 sm:$0xff] }
 0xee3   :  { %v1046_v43 = vadd.f32 %v1044_v36, %v2323_v9  ;;  %1636 = vtanh.f32 %v1087_v30  ;;  %v1519_v2 = vmul.f32 -1.442695, %v1087_v30 }
 0xee5   :  { %1638 = vtanh.f32 %v1046_v43  ;;  %v1518_v52 = vmul.f32 -1.442695, %v1046_v43 }
 0xee6   :  { %1640 = vpow2.f32 %v1519_v2 }
 0xee9   :  { %v1637_v44 = vpop.eup %1636 }
 0xeea   :  { %1110 = vrot.lane.b32.xlu2 %v1637_v44, %s1851_s1 }
 0xeeb   :  { %v1639_v1 = vpop.eup %1638 }
 0xeec   :  { %1072 = vrot.lane.b32.xlu0 %v1639_v1, %s1851_s1  ;;  %v1641_v4 = vpop.eup %1640 }
 0xeed   :  { %v1091_v7 = vadd.f32 1.0, %v1641_v4 }
 0xeef   :  { %1642 = vrcp.f32 %v1091_v7  ;;  %v1103_v58 = vand.u32 2147483648, %v1091_v7  ;;  %vm1097_vm9 = vweird.f32 %v1091_v7  ;;  %v1101_v61 = vand.u32 2147483647, %v1091_v7 }
 0xef0   :  { %1644 = vpow2.f32 %v1518_v52 }
 0xef1   :  { %v1104_v32 = vor.u32 1.1754944e-38, %v1103_v58  ;;  %vm1102_vm11 = vcmp.eq.f32.partialorder %v1101_v61, 8.507059e+37 }
 0xef5   :  { %v1643_v10 = vpop.eup %1642 }
 0xef6   :  { %v1093_v53 = vmul.f32 %v1643_v10, %v1091_v7  ;;  %v1645_v55 = vpop.eup %1644  ;;  %vm1098_vm8 = vweird.f32 %v1643_v10 }
 0xef7   :  { %v1050_v57 = vadd.f32 1.0, %v1645_v55  ;;  %vm1099_vm10 = vmor %vm1097_vm9, %vm1098_vm8 }
 0xef8   :  { %v1094_v3 = vsub.f32 1.0, %v1093_v53 }
 0xef9   :  { %1646 = vrcp.f32 %v1050_v57  ;;  %v1062_v59 = vand.u32 2147483648, %v1050_v57  ;;  %vm1056_vm13 = vweird.f32 %v1050_v57  ;;  %v1060_v28 = vand.u32 2147483647, %v1050_v57 }
 0xefa   :  { %v1095_v54 = vmul.f32 %v1643_v10, %v1094_v3 }
 0xefb   :  { %v1063_v63 = vor.u32 1.1754944e-38, %v1062_v59  ;;  %vm1061_vm15 = vcmp.eq.f32.partialorder %v1060_v28, 8.507059e+37 }
 0xefc   :  { %v1096_v56 = vadd.f32 %v1643_v10, %v1095_v54 }
 0xefe   :  { %v1100_v26 = vsel %vm1099_vm10, %v1643_v10, %v1096_v56 }
 0xeff   :  { %v1105_v11 = vsel %vm1102_vm11, %v1104_v32, %v1100_v26  ;;  %v1647_v46 = vpop.eup %1646  ;;  %vm1349_vm11 = vcmask 261126  }
 0xf00   :  { %v1052_v47 = vmul.f32 %v1647_v46, %v1050_v57  ;;  %vm1057_vm12 = vweird.f32 %v1647_v46  ;;  %v1108_v13 = vmul.f32 %v1105_v11, %v2356_v18 }
 0xf01   :  { %vm1058_vm14 = vmor %vm1056_vm13, %vm1057_vm12 }
 0xf02   :  { %v1053_v48 = vsub.f32 1.0, %v1052_v47 }
 0xf04   :  { %v1054_v49 = vmul.f32 %v1647_v46, %v1053_v48 }
 0xf06   :  { %v1055_v51 = vadd.f32 %v1647_v46, %v1054_v49 }
 0xf08   :  { %v1059_v60 = vsel %vm1058_vm14, %v1647_v46, %v1055_v51 }
 0xf09   :  { %v1064_v6 = vsel %vm1061_vm15, %v1063_v63, %v1059_v60  ;;  %vm429_vm15 = vcmask 254977  }
 0xf0a   :  { %v1070_v16 = vmul.f32 %v1068_v12, %v1064_v6 }
 0xf44   :  { %v1111_v45 = vpop.permute.xlu2 %1110 }
 0xf45   :  { %v1113_v20 = vmul.f32 %v1111_v45, %v1105_v11 }
 0xf47   :  { %1115 = vrot.lane.b32.xlu1 %v1113_v20, %s1846_s29 }
 0xf5e   :  { %v1073_v0 = vpop.permute.xlu0 %1072 }
 0xf5f   :  { %v1075_v8 = vmul.f32 %v1073_v0, %v1064_v6 }
 0xf61   :  { %1077 = vrot.lane.b32.xlu2 %v1075_v8, %s1846_s29 }
 0xfb9   :  { %v1116_v14 = vpop.permute.xlu1 %1115 }
 0xfba   :  { %v2381_v15 = vadd.f32 %v1116_v14, %v1108_v13 }
 0xfbb   :  { %v1078_v17 = vpop.permute.xlu2 %1077 }
 0xfbc   :  { %1648 = vtanh.f32 %v2381_v15  ;;  %v2384_v19 = vadd.f32 %v1078_v17, %v1070_v16 }
 0xfbe   :  { %1650 = vtanh.f32 %v2384_v19  ;;  %v1209_v0 = vrot.slane %v2384_v19, 6 }
 0xfc2   :  { %v1649_v21 = vpop.eup %1648 }
 0xfc3   :  { %1121 = vrot.lane.b32.xlu0 %v1649_v21, %s1851_s1 }
 0xfc4   :  { %v1651_v22 = vpop.eup %1650 }
 0xfc5   :  { %1083 = vrot.lane.b32.xlu1 %v1651_v22, %s1851_s1 }
0x1035   :  { %v1122_v23 = vpop.permute.xlu0 %1121 }
0x1036   :  { %v2389_v24 = vmul.f32 %v1122_v23, %v1105_v11 }
0x1037   :  { %v1084_v18 = vpop.permute.xlu1 %1083 }
0x1038   :  { %v1135_v27 = vrot.slane %v2389_v24, 4  ;;  %v1086_v25 = vmul.f32 %v1084_v18, %v1064_v6 }
0x103a   :  { %1136 = vrot.lane.b32.xlu0 %v1135_v27, %s1851_s1  ;;  %1132 = vrot.lane.b32.xlu2 %v1086_v25, %s1846_s29 }
0x1094   :  { %v1133_v31 = vpop.permute.xlu2 %1132 }
0x10ac   :  { %v1137_v33 = vpop.permute.xlu0 %1136 }
0x10ad   :  { %v1139_v35 = vsel %vm166_vm1, %v1133_v31, %v1137_v33 }
0x10ae   :  { %v1141_v34 = vrot.slane %v1139_v35, 4 }
0x10b0   :  { %1520 = vmatmul.msk.f32.vlgmr.msrb.gmra.mxu2 %vm223_vm2, %v1141_v34  ;;  %1521 = vmatmul.msk.f32.vlgmr.msrb.gmra.mxu3 %vm223_vm2, %v1141_v34 }
0x1133   :  { %v1161_v37 = vpop.f32.mrf.mxu2  ;;  %v1181_v62 = vpop.f32.mrf.mxu3 }
0x1134   :  { %v1185_v39 = vrot.slane %v1161_v37, 2  ;;  %v1228_v5 = vadd.f32 %v2397_v40, %v1181_v62 }
0x1136   :  { %v1187_v36 = vadd.f32 %v1185_v39, %v2323_v9  ;;  %1652 = vtanh.f32 %v1228_v5  ;;  %v1523_v4 = vmul.f32 -1.442695, %v1228_v5 }
0x1138   :  { %1654 = vtanh.f32 %v1187_v36  ;;  %v1522_v44 = vmul.f32 -1.442695, %v1187_v36 }
0x113a   :  { %1656 = vpow2.f32 %v1522_v44 }
0x113c   :  { %v1653_v30 = vpop.eup %1652 }
0x113d   :  { %1251 = vrot.lane.b32.xlu1 %v1653_v30, %s1851_s1 }
0x113e   :  { %v1655_v43 = vpop.eup %1654 }
0x113f   :  { %1213 = vrot.lane.b32.xlu2 %v1655_v43, %s1851_s1 }
0x1140   :  { %v1657_v1 = vpop.eup %1656 }
0x1141   :  { %v1191_v2 = vadd.f32 1.0, %v1657_v1 }
0x1143   :  { %1658 = vrcp.f32 %v1191_v2  ;;  %v1203_v55 = vand.u32 2147483648, %v1191_v2  ;;  %vm1197_vm4 = vweird.f32 %v1191_v2  ;;  %v1201_v56 = vand.u32 2147483647, %v1191_v2 }
0x1144   :  { %1660 = vpow2.f32 %v1523_v4 }
0x1145   :  { %v1204_v58 = vor.u32 1.1754944e-38, %v1203_v55  ;;  %vm1202_vm6 = vcmp.eq.f32.partialorder %v1201_v56, 8.507059e+37 }
0x1149   :  { %v1659_v7 = vpop.eup %1658 }
0x114a   :  { %v1193_v10 = vmul.f32 %v1659_v7, %v1191_v2  ;;  %v1661_v53 = vpop.eup %1660  ;;  %vm1198_vm3 = vweird.f32 %v1659_v7 }
0x114b   :  { %v1232_v3 = vadd.f32 1.0, %v1661_v53  ;;  %vm1199_vm5 = vmor %vm1197_vm4, %vm1198_vm3  ;;  %vm1352_vm3 = vcmask 254976  }
0x114c   :  { %v1194_v52 = vsub.f32 1.0, %v1193_v10 }
0x114d   :  { %1662 = vrcp.f32 %v1232_v3  ;;  %v1244_v48 = vand.u32 2147483648, %v1232_v3  ;;  %vm1238_vm8 = vweird.f32 %v1232_v3  ;;  %v1242_v49 = vand.u32 2147483647, %v1232_v3 }
0x114e   :  { %v1195_v9 = vmul.f32 %v1659_v7, %v1194_v52 }
0x114f   :  { %v1245_v59 = vor.u32 1.1754944e-38, %v1244_v48  ;;  %vm1243_vm10 = vcmp.eq.f32.partialorder %v1242_v49, 8.507059e+37  ;;  %v1547_v49 = vld [vmem:[#allocation11 + $0x20] ss:$0 sm:$0xff] }
0x1150   :  { %v1196_v54 = vadd.f32 %v1659_v7, %v1195_v9 }
0x1152   :  { %v1200_v57 = vsel %vm1199_vm5, %v1659_v7, %v1196_v54 }
0x1153   :  { %v1663_v61 = vpop.eup %1662  ;;  %v1205_v32 = vsel %vm1202_vm6, %v1204_v58, %v1200_v57 }
0x1154   :  { %v1234_v11 = vmul.f32 %v1663_v61, %v1232_v3  ;;  %vm1239_vm7 = vweird.f32 %v1663_v61  ;;  %v1211_v6 = vmul.f32 %v1209_v0, %v1205_v32 }
0x1155   :  { %vm1240_vm9 = vmor %vm1238_vm8, %vm1239_vm7 }
0x1156   :  { %v1235_v20 = vsub.f32 1.0, %v1234_v11  ;;  %v1368_v11 = vld [vmem:[#allocation11 + $0x8] sm:$0xff] }
0x1158   :  { %v1236_v46 = vmul.f32 %v1663_v61, %v1235_v20  ;;  %v1367_v20 = vld [vmem:[#allocation11] sm:$0xff] }
0x115a   :  { %v1237_v47 = vadd.f32 %v1663_v61, %v1236_v46 }
0x115c   :  { %v1241_v51 = vsel %vm1240_vm9, %v1663_v61, %v1237_v47 }
0x115d   :  { %v1246_v60 = vsel %vm1243_vm10, %v1245_v59, %v1241_v51 }
0x115e   :  { %v1249_v14 = vmul.f32 %v1246_v60, %v2381_v15 }
0x1199   :  { %v1214_v26 = vpop.permute.xlu2 %1213 }
0x119a   :  { %v1216_v45 = vmul.f32 %v1214_v26, %v1205_v32 }
0x119c   :  { %1218 = vrot.lane.b32.xlu1 %v1216_v45, %s1846_s29  ;;  %v1369_v45 = vld [vmem:[#allocation11 + $0x10] sm:$0xff] }
0x11af   :  { %v1252_v28 = vpop.permute.xlu1 %1251 }
0x11b0   :  { %v1254_v63 = vmul.f32 %v1252_v28, %v1246_v60 }
0x11b2   :  { %1256 = vrot.lane.b32.xlu0 %v1254_v63, %s1846_s29 }
0x120e   :  { %v1219_v8 = vpop.permute.xlu1 %1218 }
0x120f   :  { %v2406_v12 = vadd.f32 %v1219_v8, %v1211_v6 }
0x1211   :  { %1664 = vtanh.f32 %v2406_v12 }
0x1217   :  { %v1665_v13 = vpop.eup %1664 }
0x1218   :  { %1224 = vrot.lane.b32.xlu0 %v1665_v13, %s1851_s1 }
0x1224   :  { %v1257_v16 = vpop.permute.xlu0 %1256 }
0x1225   :  { %v1259_v17 = vadd.f32 %v1257_v16, %v1249_v14 }
0x1227   :  { %1666 = vtanh.f32 %v1259_v17 }
0x122d   :  { %v1667_v21 = vpop.eup %1666 }
0x122e   :  { %1262 = vrot.lane.b32.xlu2 %v1667_v21, %s1851_s1 }
0x1288   :  { %v1263_v22 = vpop.permute.xlu2 %1262 }
0x1289   :  { %v1265_v23 = vmul.f32 %v1263_v22, %v1246_v60 }
0x128a   :  { %v1225_v19 = vpop.permute.xlu0 %1224 }
0x128b   :  { %v1276_v18 = vrot.slane %v1265_v23, 2  ;;  %v1227_v27 = vmul.f32 %v1225_v19, %v1205_v32 }
0x128d   :  { %1277 = vrot.lane.b32.xlu2 %v1276_v18, %s1851_s1  ;;  %1273 = vrot.lane.b32.xlu1 %v1227_v27, %s1846_s29 }
0x12e7   :  { %v1278_v25 = vpop.permute.xlu2 %1277 }
0x12ff   :  { %v1274_v31 = vpop.permute.xlu1 %1273 }
0x1300   :  { %v1280_v15 = vsel %vm166_vm1, %v1274_v31, %v1278_v25  ;;  %1350 = vst.msk [vmem:[#allocation13 - $0x6] sm:$0xc0] %vm1349_vm11, %v1274_v31 }
0x1301   :  { %v1282_v33 = vrot.slane %v1280_v15, 6 }
0x1303   :  { %1524 = vmatmul.msk.f32.vlgmr.msra.gmra.mxu0 %vm223_vm2, %v1282_v33 }
0x1380   :  { %v1302_v35 = vpop.f32.mrf.mxu0 }
0x1381   :  { %v1305_v34 = vadd.f32 %v2397_v40, %v1302_v35 }
0x1383   :  { %1668 = vtanh.f32 %v1305_v34  ;;  %v1525_v62 = vmul.f32 -1.442695, %v1305_v34 }
0x1385   :  { %1670 = vpow2.f32 %v1525_v62 }
0x1389   :  { %v1669_v37 = vpop.eup %1668 }
0x138a   :  { %1328 = vrot.lane.b32.xlu0 %v1669_v37, %s1851_s1 }
0x138b   :  { %v1671_v39 = vpop.eup %1670 }
0x138c   :  { %v1309_v5 = vadd.f32 1.0, %v1671_v39 }
0x138e   :  { %1672 = vrcp.f32 %v1309_v5  ;;  %v1321_v1 = vand.u32 2147483648, %v1309_v5  ;;  %vm1315_vm12 = vweird.f32 %v1309_v5  ;;  %v1319_v2 = vand.u32 2147483647, %v1309_v5 }
0x1390   :  { %v1322_v4 = vor.u32 1.1754944e-38, %v1321_v1  ;;  %vm1320_vm14 = vcmp.eq.f32.partialorder %v1319_v2, 8.507059e+37 }
0x1392   :  { %425 = vrot.lane.b32.xlu0 %v2190_v50, %s1846_s29 }
0x1394   :  { %v1673_v36 = vpop.eup %1672 }
0x1395   :  { %v1311_v30 = vmul.f32 %v1673_v36, %v1309_v5  ;;  %vm1316_vm2 = vweird.f32 %v1673_v36 }
0x1396   :  { %vm1317_vm13 = vmor %vm1315_vm12, %vm1316_vm2 }
0x1397   :  { %v1312_v40 = vsub.f32 1.0, %v1311_v30 }
0x1399   :  { %v1313_v43 = vmul.f32 %v1673_v36, %v1312_v40 }
0x139a   :  { %846 = vrot.lane.b32.xlu0 %v2341_v41, %s1846_s29 }
0x139b   :  { %v1314_v44 = vadd.f32 %v1673_v36, %v1313_v43 }
0x139d   :  { %v1318_v50 = vsel %vm1317_vm13, %v1673_v36, %v1314_v44 }
0x139e   :  { %v1323_v7 = vsel %vm1320_vm14, %v1322_v4, %v1318_v50 }
0x139f   :  { %v1326_v3 = vmul.f32 %v1323_v7, %v1259_v17 }
0x13a2   :  { %1267 = vrot.lane.b32.xlu0 %v1265_v23, %s1846_s29 }
0x13fc   :  { %v1329_v41 = vpop.permute.xlu0 %1328 }
0x13fd   :  { %v1331_v10 = vmul.f32 %v1329_v41, %v1323_v7 }
0x13ff   :  { %1333 = vrot.lane.b32.xlu1 %v1331_v10, %s1846_s29 }
0x1404   :  { %v426_v52 = vpop.permute.xlu0 %425 }
0x1405   :  { %428 = vst.msk [vmem:[#allocation3] sm:$0x1] %vm95_vm0, %v426_v52 }
0x1406   :  { %430 = vst.msk [vmem:[#allocation3 + $0x7] sm:$0x2] %vm429_vm15, %v426_v52 }
0x1407   :  { %567 = vrot.lane.b32.xlu1 %v2265_v38, %s1846_s29 }
0x140c   :  { %v847_v53 = vpop.permute.xlu0 %846 }
0x140d   :  { %849 = vst.msk [vmem:[#allocation3 + $0x3] sm:$0x1] %vm95_vm0, %v847_v53 }
0x140e   :  { %850 = vst.msk [vmem:[#allocation3 + $0xa] sm:$0x2] %vm429_vm15, %v847_v53 }
0x140f   :  { %985 = vrot.lane.b32.xlu1 %v2365_v29, %s1846_s29 }
0x1414   :  { %v1268_v9 = vpop.permute.xlu0 %1267 }
0x1415   :  { %1270 = vst.msk [vmem:[#allocation3 + $0x6] sm:$0x1] %vm95_vm0, %v1268_v9 }
0x1416   :  { %1271 = vst.msk [vmem:[#allocation3 + $0xd] sm:$0x2] %vm429_vm15, %v1268_v9 }
0x1471   :  { %v1334_v54 = vpop.permute.xlu1 %1333 }
0x1472   :  { %v1336_v55 = vadd.f32 %v1334_v54, %v1326_v3 }
0x1474   :  { %1674 = vtanh.f32 %v1336_v55  ;;  %1360 = vrot.lane.b32.xlu0 %v1336_v55, %s1852_s3 }
0x1479   :  { %v568_v38 = vpop.permute.xlu1 %567 }
0x147a   :  { %v1675_v56 = vpop.eup %1674  ;;  %570 = vst.msk [vmem:[#allocation3 + $0x1] sm:$0x1] %vm95_vm0, %v568_v38 }
0x147b   :  { %571 = vst.msk [vmem:[#allocation3 + $0x8] sm:$0x2] %vm429_vm15, %v568_v38  ;;  %1339 = vrot.lane.b32.xlu2 %v1675_v56, %s1851_s1  ;;  %s1853_s1 = smov [#allocation13]  }
0x147c   :  { %s1421_s20 = sshll.u32 %s1853_s1, 4  ;;  %s1422_s20 = int_to_ptr.vmem [resolvable:$true] %s1421_s20 }
0x1481   :  { %v986_v29 = vpop.permute.xlu1 %985 }
0x1482   :  { %988 = vst.msk [vmem:[#allocation3 + $0x4] sm:$0x1] %vm95_vm0, %v986_v29 }
0x1483   :  { %989 = vst.msk [vmem:[#allocation3 + $0xb] sm:$0x2] %vm429_vm15, %v986_v29  ;;  %708 = vrot.lane.b32.xlu2 %v2305_v42, %s1846_s29 }
0x148b   :  { %1126 = vrot.lane.b32.xlu2 %v2389_v24, %s1846_s29  ;;  %v1370_v24 = vld [vmem:[#allocation11 + $0x18] sm:$0xff] }
0x148c   :  { %1528 = vmatpush.msra.mxu2 %v1370_v24  ;;  %1391 = vmatpush.msra.mxu1 %v1370_v24 }
0x148e   :  { %1529 = vmatpush.msra.mxu2 %v1369_v45  ;;  %1392 = vmatpush.msra.mxu1 %v1369_v45 }
0x1490   :  { %1530 = vmatpush.msra.mxu2 %v1368_v11  ;;  %1393 = vmatpush.msra.mxu1 %v1368_v11 }
0x1492   :  { %1531 = vmatpush.msra.mxu2 %v1367_v20  ;;  %1394 = vmatpush.msra.mxu1 %v1367_v20 }
0x1493   :  { %1355 = vrot.lane.b32.xlu2 %v2406_v12, %s1852_s3 }
0x14d5   :  { %v1340_v57 = vpop.permute.xlu2 %1339 }
0x14d6   :  { %v1342_v58 = vmul.f32 %v1340_v57, %v1323_v7 }
0x14d8   :  { %1344 = vrot.lane.b32.xlu1 %v1342_v58, %s1846_s29 }
0x14dd   :  { %v709_v61 = vpop.permute.xlu2 %708 }
0x14de   :  { %711 = vst.msk [vmem:[#allocation3 + $0x2] sm:$0x1] %vm95_vm0, %v709_v61 }
0x14df   :  { %712 = vst.msk [vmem:[#allocation3 + $0x9] sm:$0x2] %vm429_vm15, %v709_v61 }
0x14e5   :  { %v1127_v26 = vpop.permute.xlu2 %1126 }
0x14e6   :  { %1129 = vst.msk [vmem:[#allocation3 + $0x5] sm:$0x1] %vm95_vm0, %v1127_v26  ;;  %v1361_v32 = vpop.permute.xlu0 %1360 }
0x14e7   :  { %1130 = vst.msk [vmem:[#allocation3 + $0xc] sm:$0x2] %vm429_vm15, %v1127_v26 }
0x14e8   :  { %1364 = vst.msk [vmem:[#allocation15 + $0x2] sm:$0x3] %vm1352_vm3, %v1361_v32 }
0x14ed   :  { %v1356_v42 = vpop.permute.xlu2 %1355 }
0x14ee   :  { %1358 = vst.msk [vmem:[#allocation15 - $0x6] sm:$0xc0] %vm1349_vm11, %v1356_v42 }
0x154a   :  { %v1345_v46 = vpop.permute.xlu1 %1344 }
0x154b   :  { %1347 = vst.msk [vmem:[#allocation3 + $0x7] sm:$0x1] %vm95_vm0, %v1345_v46 }
0x154c   :  { %1348 = vst.msk [vmem:[#allocation3 + $0xe] sm:$0x2] %vm429_vm15, %v1345_v46 }
0x154d   :  { %1353 = vst.msk [vmem:[#allocation13 + $0x2] sm:$0x3] %vm1352_vm3, %v1345_v46 }
0x154e   :  { %1429 = dma.vmem_to_hbm [thread:$0]  %s1422_s20, 64, %s1424_s27, [#allocation14], %s1846_s29, %s1846_s29, %s1847_s30  }
0x154f   :  { %1442 = dma.vmem_to_hbm [thread:$0]  %s1435_s11, 64, %s1437_s4, [#allocation14], %s1846_s29, %s1846_s29, %s1847_s30  }
0x1552   :  { %v1365_v47 = vld [vmem:[#allocation3] sm:$0xff] }
0x1553   :  { %1526 = vmatmul.msk.f32.vlgmr.msra.gmra.mxu1 %vm166_vm1, %v1365_v47  ;;  %v1366_v48 = vld [vmem:[#allocation3 + $0x8] sm:$0xff] }
0x1554   :  { %1527 = vmatmul.msk.f32.vlgmr.msra.gmra.mxu2 %vm166_vm1, %v1366_v48 }
0x15d0   :  { %v1396_v51 = vpop.f32.mrf.mxu1 }
0x15d1   :  { %v1397_v59 = vadd.f32 %v1547_v49, %v1396_v51 }
0x15d3   :  { %1402 = vst [vmem:[#allocation12] sm:$0xff] %v1397_v59 }
0x15d7   :  { %v1399_v28 = vpop.f32.mrf.mxu2 }
0x15d8   :  { %v1400_v60 = vadd.f32 %v1547_v49, %v1399_v28 }
0x15da   :  { %1403 = vst [vmem:[#allocation12 + $0x8] sm:$0xff] %v1400_v60 }
0x15db   :  { %1416 = dma.vmem_to_hbm [thread:$0]  %s1409_s14, 256, %s1411_s24, [#allocation6], %s2489_s16, %s2489_s16, %s2488_s10  }
0x15dc   :  { %1839 = dma.done.wait [#allocation6], 256  }
0x15dd   :  { %1840 = vsyncadd [#allocation6], 4294967040 }
0x15de   :  { %1841 = dma.done.wait [#allocation14], 128  }
0x15df   :  { %1842 = vsyncadd [#allocation14], 4294967168 }
0x15e0   :  { %1455 = vsyncpa [#allocation5], 1 }
0x15e1   :  { %1456 = vsyncpa [#allocation10], 1 }
0x15e2   :  { %1457 = vsyncpa [#allocation6], 1 }
0x15e3   :  { %1458 = vsyncpa [#allocation14], 1 }
0x15e4   :  { %1459 = vsyncpa [#allocation7], 1 }

</bundles_post_ra>
